<compile_context>
chip_gen: v7x
topology: tpu7x:2x2x1
jax: 0.10.0
libtpu: 0.0.40
codegen_flags: <defaults>
</compile_context>

<pallas_src>
import functools

import jax
import jax.numpy as jnp
from jax import lax
from jax.experimental import pallas as pl
from jax.experimental.pallas import tpu as pltpu

# ---- module hyperparameters (the **kwargs of nn.Conv2d) ----------------------
# ConvBlockDis(input_ch, output_ch, kernel_size=3, stride=1, padding=1)
KH = KW = 3
STRIDE = 1
PAD = 1
EPS = 1e-5          # InstanceNorm2d default eps
NEG_SLOPE = 0.2     # LeakyReLU slope


def _conv_in_lrelu_kernel(x_ref, w_ref, out_ref, *, th, wout, cin, cout, p):
    """One grid step = one row-tile of one batch element.

    x_ref   : (1, Hp, Wp, Cin)  bf16, reflect-padded NHWC sample (VMEM-resident)
    w_ref   : (KH*KW, Cin, Cout) bf16, shifted weight matrices (VMEM-resident)
    out_ref : (1, Cout, P)      f32, per-sample channel-major output slab
                                (resident across the tile axis)
    """
    t = pl.program_id(1)
    n_t = pl.num_programs(1)
    tp = th * wout
    h0 = t * th

    # --- conv for this row tile: 9 shifted matmuls, f32 accumulation ---------
    acc = jnp.zeros((tp, cout), jnp.float32)
    for kk in range(KH * KW):                 # static unroll (9 iterations)
        di, dj = kk // KW, kk % KW
        x_sl = x_ref[0, pl.ds(h0 + di, th), pl.ds(dj, wout), :]   # (th, wout, cin)
        x_flat = x_sl.reshape(tp, cin)                            # (tp, cin)
        acc = acc + jnp.dot(x_flat, w_ref[kk],
                            preferred_element_type=jnp.float32)   # MXU, K = Cin

    # Channel-major, lane-dense store into the resident per-sample slab.
    col0 = pl.multiple_of(t * tp, tp)
    out_ref[0, :, pl.ds(col0, tp)] = jnp.transpose(acc)           # (cout, tp)

    # --- last tile: instance-norm + LeakyReLU over the whole sample ----------
    @pl.when(t == n_t - 1)
    def _():
        y = out_ref[0]                                            # (cout, p) f32
        inv_p = jnp.float32(1.0 / p)
        mean = jnp.sum(y, axis=1, keepdims=True) * inv_p          # lane-axis reduce
        centered = y - mean
        var = jnp.sum(centered * centered, axis=1, keepdims=True) * inv_p
        y_n = centered * lax.rsqrt(var + EPS)                     # EUP rsqrt
        out_ref[0] = jnp.where(y_n >= 0, y_n, NEG_SLOPE * y_n)


def _pick_tile_rows(hout, wout):
    """Largest divisor of Hout giving a modest, 128-lane-aligned tile if possible."""
    divisors = [d for d in range(1, hout + 1) if hout % d == 0]
    fits = [d for d in divisors if d * wout <= 1024]
    if not fits:
        return 1
    lane_aligned = [d for d in fits if (d * wout) % 128 == 0]
    return max(lane_aligned) if lane_aligned else max(fits)


@functools.partial(jax.jit, static_argnames=("tile_rows",))
def conv_block_dis(x, weight, bias=None, *, tile_rows=None):
    """x: (N, Cin, H, W) NCHW, weight: (Cout, Cin, KH, KW), bias: (Cout,) (ignored)."""
    del bias  # InstanceNorm2d(affine=False) removes any per-channel constant.

    n, cin, h, w = x.shape
    cout = weight.shape[0]
    hout = (h + 2 * PAD - KH) // STRIDE + 1
    wout = (w + 2 * PAD - KW) // STRIDE + 1
    p = hout * wout

    th = tile_rows if tile_rows is not None else _pick_tile_rows(hout, wout)
    assert hout % th == 0, (hout, th)
    n_ht = hout // th

    # NCHW -> NHWC, reflect pad, bf16 MXU operand (channels-last gives clean
    # (TP, Cin) matmul tiles in-kernel; no 9x im2col inflation in HBM).
    x_nhwc = jnp.transpose(x, (0, 2, 3, 1))
    xp = jnp.pad(x_nhwc, ((0, 0), (PAD, PAD), (PAD, PAD), (0, 0)),
                 mode="reflect").astype(jnp.bfloat16)
    hp, wp = h + 2 * PAD, w + 2 * PAD

    # (Cout, Cin, KH, KW) -> (KH*KW, Cin, Cout): w_k[i*KW+j][c, o] == W[o, c, i, j]
    w_k = jnp.transpose(weight, (2, 3, 1, 0)).reshape(KH * KW, cin, cout)
    w_k = w_k.astype(jnp.bfloat16)

    kernel = functools.partial(_conv_in_lrelu_kernel,
                               th=th, wout=wout, cin=cin, cout=cout, p=p)

    flops = 2 * n * p * (cin * KH * KW) * cout
    bytes_accessed = xp.size * 2 + w_k.size * 2 + n * cout * p * 4

    out = pl.pallas_call(
        kernel,
        out_shape=jax.ShapeDtypeStruct((n, cout, p), jnp.float32),
        grid_spec=pltpu.PrefetchScalarGridSpec(
            num_scalar_prefetch=0,
            grid=(n, n_ht),
            in_specs=[
                # Full padded sample, resident in VMEM across the tile axis.
                pl.BlockSpec((1, hp, wp, cin), lambda b, t: (b, 0, 0, 0)),
                # All 9 shifted weight matrices, resident.
                pl.BlockSpec((KH * KW, cin, cout), lambda b, t: (0, 0, 0)),
            ],
            # Per-sample channel-major output slab; resident across tiles,
            # written back to HBM once per sample.
            out_specs=pl.BlockSpec((1, cout, p), lambda b, t: (b, 0, 0)),
        ),
        compiler_params=pltpu.CompilerParams(
            dimension_semantics=("parallel", "arbitrary"),
            vmem_limit_bytes=64 * 1024 * 1024,
        ),
        cost_estimate=pl.CostEstimate(
            flops=flops, transcendentals=n * cout, bytes_accessed=bytes_accessed),
    )(xp, w_k)

    # Channel-major (N, Cout, P) is already NCHW memory order: free reshape.
    return out.reshape(n, cout, hout, wout)


def _reference(x, weight, bias):
    """Pure-JAX reference of the same forward pass (keeps the conv bias)."""
    xp = jnp.pad(x, ((0, 0), (0, 0), (PAD, PAD), (PAD, PAD)), mode="reflect")
    y = lax.conv_general_dilated(
        xp, weight, window_strides=(STRIDE, STRIDE), padding="VALID",
        dimension_numbers=("NCHW", "OIHW", "NCHW"),
    ) + bias.reshape(1, -1, 1, 1)
    mean = jnp.mean(y, axis=(2, 3), keepdims=True)
    var = jnp.mean((y - mean) ** 2, axis=(2, 3), keepdims=True)
    yn = (y - mean) * lax.rsqrt(var + EPS)
    return jnp.where(yn >= 0, yn, NEG_SLOPE * yn)


if __name__ == "__main__":
    key = jax.random.PRNGKey(0)
    kx, kw_, kb = jax.random.split(key, 3)

    N, Cin, H, W = 2, 4, 16, 16
    Cout = 8

    x = jax.random.normal(kx, (N, Cin, H, W), dtype=jnp.float32)
    weight = jax.random.normal(kw_, (Cout, Cin, KH, KW), dtype=jnp.float32) * 0.1
    bias = jax.random.normal(kb, (Cout,), dtype=jnp.float32) * 0.1

    # tile_rows=8 -> TP = 128, 2 row-tiles per sample (exercises the tiled
    # stats-at-last-tile path at these small shapes).
    out = jax.block_until_ready(conv_block_dis(x, weight, bias, tile_rows=8))
    assert out.shape == (N, Cout, H, W), out.shape

    # Reference on bf16-rounded operands (kernel feeds the MXU bf16, accumulates
    # f32).  The reference keeps the conv bias, which must cancel exactly under
    # InstanceNorm(affine=False).
    x_r = x.astype(jnp.bfloat16).astype(jnp.float32)
    w_r = weight.astype(jnp.bfloat16).astype(jnp.float32)
    ref = jax.block_until_ready(_reference(x_r, w_r, bias))
    max_err = float(jnp.max(jnp.abs(out - ref)))
    assert jnp.allclose(out, ref, atol=3e-3, rtol=3e-3), max_err

    print("KERNEL_OK")
</pallas_src>

<mosaic_0001>
module attributes {stable_mosaic.version = 11 : i64} {
  func.func @_conv_in_lrelu_kernel(%arg0: i32, %arg1: i32, %arg2: memref<1x18x18x4xbf16, #tpu.memory_space<vmem>>, %arg3: memref<9x4x8xbf16, #tpu.memory_space<vmem>>, %arg4: memref<1x8x256xf32, #tpu.memory_space<vmem>>) attributes {dimension_semantics = [#tpu.dimension_semantics<parallel>, #tpu.dimension_semantics<arbitrary>], iteration_bounds = array<i64: 2, 2>, scalar_prefetch = 0 : i64, scratch_operands = 0 : i64, tpu.core_type = #tpu.core_type<tc>, window_params = [{transform_indices = @transform_0, window_bounds = array<i64: 1, 18, 18, 4>}, {pipeline_mode = #tpu.pipeline_mode<synchronous>, transform_indices = @transform_1, window_bounds = array<i64: 9, 4, 8>}, {transform_indices = @transform_2, window_bounds = array<i64: 1, 8, 256>}]} {
    %c8_i32 = arith.constant 8 : i32
    %0 = arith.muli %arg1, %c8_i32 : i32
    %cst = arith.constant 0.000000e+00 : f32
    %1 = vector.broadcast %cst : f32 to vector<128x8xf32>
    %c0_i32 = arith.constant 0 : i32
    %2 = arith.addi %0, %c0_i32 : i32
    %c0 = arith.constant 0 : index
    %3 = arith.index_cast %2 : i32 to index
    %c0_0 = arith.constant 0 : index
    %c0_1 = arith.constant 0 : index
    %4 = vector.load %arg2[%c0, %3, %c0_0, %c0_1] : memref<1x18x18x4xbf16, #tpu.memory_space<vmem>>, vector<1x8x16x4xbf16>
    %5 = vector.shape_cast %4 : vector<1x8x16x4xbf16> to vector<8x16x4xbf16>
    %6 = vector.shape_cast %5 : vector<8x16x4xbf16> to vector<128x4xbf16>
    %c0_2 = arith.constant 0 : index
    %c0_3 = arith.constant 0 : index
    %c0_4 = arith.constant 0 : index
    %7 = vector.load %arg3[%c0_2, %c0_3, %c0_4] : memref<9x4x8xbf16, #tpu.memory_space<vmem>>, vector<1x4x8xbf16>
    %8 = vector.shape_cast %7 : vector<1x4x8xbf16> to vector<4x8xbf16>
    %cst_5 = arith.constant dense<0.000000e+00> : vector<128x8xf32>
    %9 = tpu.matmul %6, %8, %cst_5 {dimension_numbers = #tpu.dot_dimension_numbers<[1], [0], [0], [1], [0, 0, 1, 1], [], []>} : vector<128x4xbf16>, vector<4x8xbf16>, vector<128x8xf32> -> vector<128x8xf32>
    %10 = arith.addf %1, %9 : vector<128x8xf32>
    %c0_i32_6 = arith.constant 0 : i32
    %11 = arith.addi %0, %c0_i32_6 : i32
    %c0_7 = arith.constant 0 : index
    %12 = arith.index_cast %11 : i32 to index
    %c1 = arith.constant 1 : index
    %c0_8 = arith.constant 0 : index
    %13 = vector.load %arg2[%c0_7, %12, %c1, %c0_8] : memref<1x18x18x4xbf16, #tpu.memory_space<vmem>>, vector<1x8x16x4xbf16>
    %14 = vector.shape_cast %13 : vector<1x8x16x4xbf16> to vector<8x16x4xbf16>
    %15 = vector.shape_cast %14 : vector<8x16x4xbf16> to vector<128x4xbf16>
    %c1_9 = arith.constant 1 : index
    %c0_10 = arith.constant 0 : index
    %c0_11 = arith.constant 0 : index
    %16 = vector.load %arg3[%c1_9, %c0_10, %c0_11] : memref<9x4x8xbf16, #tpu.memory_space<vmem>>, vector<1x4x8xbf16>
    %17 = vector.shape_cast %16 : vector<1x4x8xbf16> to vector<4x8xbf16>
    %cst_12 = arith.constant dense<0.000000e+00> : vector<128x8xf32>
    %18 = tpu.matmul %15, %17, %cst_12 {dimension_numbers = #tpu.dot_dimension_numbers<[1], [0], [0], [1], [0, 0, 1, 1], [], []>} : vector<128x4xbf16>, vector<4x8xbf16>, vector<128x8xf32> -> vector<128x8xf32>
    %19 = arith.addf %10, %18 : vector<128x8xf32>
    %c0_i32_13 = arith.constant 0 : i32
    %20 = arith.addi %0, %c0_i32_13 : i32
    %c0_14 = arith.constant 0 : index
    %21 = arith.index_cast %20 : i32 to index
    %c2 = arith.constant 2 : index
    %c0_15 = arith.constant 0 : index
    %22 = vector.load %arg2[%c0_14, %21, %c2, %c0_15] : memref<1x18x18x4xbf16, #tpu.memory_space<vmem>>, vector<1x8x16x4xbf16>
    %23 = vector.shape_cast %22 : vector<1x8x16x4xbf16> to vector<8x16x4xbf16>
    %24 = vector.shape_cast %23 : vector<8x16x4xbf16> to vector<128x4xbf16>
    %c2_16 = arith.constant 2 : index
    %c0_17 = arith.constant 0 : index
    %c0_18 = arith.constant 0 : index
    %25 = vector.load %arg3[%c2_16, %c0_17, %c0_18] : memref<9x4x8xbf16, #tpu.memory_space<vmem>>, vector<1x4x8xbf16>
    %26 = vector.shape_cast %25 : vector<1x4x8xbf16> to vector<4x8xbf16>
    %cst_19 = arith.constant dense<0.000000e+00> : vector<128x8xf32>
    %27 = tpu.matmul %24, %26, %cst_19 {dimension_numbers = #tpu.dot_dimension_numbers<[1], [0], [0], [1], [0, 0, 1, 1], [], []>} : vector<128x4xbf16>, vector<4x8xbf16>, vector<128x8xf32> -> vector<128x8xf32>
    %28 = arith.addf %19, %27 : vector<128x8xf32>
    %c1_i32 = arith.constant 1 : i32
    %29 = arith.addi %0, %c1_i32 : i32
    %c0_20 = arith.constant 0 : index
    %30 = arith.index_cast %29 : i32 to index
    %c0_21 = arith.constant 0 : index
    %c0_22 = arith.constant 0 : index
    %31 = vector.load %arg2[%c0_20, %30, %c0_21, %c0_22] : memref<1x18x18x4xbf16, #tpu.memory_space<vmem>>, vector<1x8x16x4xbf16>
    %32 = vector.shape_cast %31 : vector<1x8x16x4xbf16> to vector<8x16x4xbf16>
    %33 = vector.shape_cast %32 : vector<8x16x4xbf16> to vector<128x4xbf16>
    %c3 = arith.constant 3 : index
    %c0_23 = arith.constant 0 : index
    %c0_24 = arith.constant 0 : index
    %34 = vector.load %arg3[%c3, %c0_23, %c0_24] : memref<9x4x8xbf16, #tpu.memory_space<vmem>>, vector<1x4x8xbf16>
    %35 = vector.shape_cast %34 : vector<1x4x8xbf16> to vector<4x8xbf16>
    %cst_25 = arith.constant dense<0.000000e+00> : vector<128x8xf32>
    %36 = tpu.matmul %33, %35, %cst_25 {dimension_numbers = #tpu.dot_dimension_numbers<[1], [0], [0], [1], [0, 0, 1, 1], [], []>} : vector<128x4xbf16>, vector<4x8xbf16>, vector<128x8xf32> -> vector<128x8xf32>
    %37 = arith.addf %28, %36 : vector<128x8xf32>
    %c1_i32_26 = arith.constant 1 : i32
    %38 = arith.addi %0, %c1_i32_26 : i32
    %c0_27 = arith.constant 0 : index
    %39 = arith.index_cast %38 : i32 to index
    %c1_28 = arith.constant 1 : index
    %c0_29 = arith.constant 0 : index
    %40 = vector.load %arg2[%c0_27, %39, %c1_28, %c0_29] : memref<1x18x18x4xbf16, #tpu.memory_space<vmem>>, vector<1x8x16x4xbf16>
    %41 = vector.shape_cast %40 : vector<1x8x16x4xbf16> to vector<8x16x4xbf16>
    %42 = vector.shape_cast %41 : vector<8x16x4xbf16> to vector<128x4xbf16>
    %c4 = arith.constant 4 : index
    %c0_30 = arith.constant 0 : index
    %c0_31 = arith.constant 0 : index
    %43 = vector.load %arg3[%c4, %c0_30, %c0_31] : memref<9x4x8xbf16, #tpu.memory_space<vmem>>, vector<1x4x8xbf16>
    %44 = vector.shape_cast %43 : vector<1x4x8xbf16> to vector<4x8xbf16>
    %cst_32 = arith.constant dense<0.000000e+00> : vector<128x8xf32>
    %45 = tpu.matmul %42, %44, %cst_32 {dimension_numbers = #tpu.dot_dimension_numbers<[1], [0], [0], [1], [0, 0, 1, 1], [], []>} : vector<128x4xbf16>, vector<4x8xbf16>, vector<128x8xf32> -> vector<128x8xf32>
    %46 = arith.addf %37, %45 : vector<128x8xf32>
    %c1_i32_33 = arith.constant 1 : i32
    %47 = arith.addi %0, %c1_i32_33 : i32
    %c0_34 = arith.constant 0 : index
    %48 = arith.index_cast %47 : i32 to index
    %c2_35 = arith.constant 2 : index
    %c0_36 = arith.constant 0 : index
    %49 = vector.load %arg2[%c0_34, %48, %c2_35, %c0_36] : memref<1x18x18x4xbf16, #tpu.memory_space<vmem>>, vector<1x8x16x4xbf16>
    %50 = vector.shape_cast %49 : vector<1x8x16x4xbf16> to vector<8x16x4xbf16>
    %51 = vector.shape_cast %50 : vector<8x16x4xbf16> to vector<128x4xbf16>
    %c5 = arith.constant 5 : index
    %c0_37 = arith.constant 0 : index
    %c0_38 = arith.constant 0 : index
    %52 = vector.load %arg3[%c5, %c0_37, %c0_38] : memref<9x4x8xbf16, #tpu.memory_space<vmem>>, vector<1x4x8xbf16>
    %53 = vector.shape_cast %52 : vector<1x4x8xbf16> to vector<4x8xbf16>
    %cst_39 = arith.constant dense<0.000000e+00> : vector<128x8xf32>
    %54 = tpu.matmul %51, %53, %cst_39 {dimension_numbers = #tpu.dot_dimension_numbers<[1], [0], [0], [1], [0, 0, 1, 1], [], []>} : vector<128x4xbf16>, vector<4x8xbf16>, vector<128x8xf32> -> vector<128x8xf32>
    %55 = arith.addf %46, %54 : vector<128x8xf32>
    %c2_i32 = arith.constant 2 : i32
    %56 = arith.addi %0, %c2_i32 : i32
    %c0_40 = arith.constant 0 : index
    %57 = arith.index_cast %56 : i32 to index
    %c0_41 = arith.constant 0 : index
    %c0_42 = arith.constant 0 : index
    %58 = vector.load %arg2[%c0_40, %57, %c0_41, %c0_42] : memref<1x18x18x4xbf16, #tpu.memory_space<vmem>>, vector<1x8x16x4xbf16>
    %59 = vector.shape_cast %58 : vector<1x8x16x4xbf16> to vector<8x16x4xbf16>
    %60 = vector.shape_cast %59 : vector<8x16x4xbf16> to vector<128x4xbf16>
    %c6 = arith.constant 6 : index
    %c0_43 = arith.constant 0 : index
    %c0_44 = arith.constant 0 : index
    %61 = vector.load %arg3[%c6, %c0_43, %c0_44] : memref<9x4x8xbf16, #tpu.memory_space<vmem>>, vector<1x4x8xbf16>
    %62 = vector.shape_cast %61 : vector<1x4x8xbf16> to vector<4x8xbf16>
    %cst_45 = arith.constant dense<0.000000e+00> : vector<128x8xf32>
    %63 = tpu.matmul %60, %62, %cst_45 {dimension_numbers = #tpu.dot_dimension_numbers<[1], [0], [0], [1], [0, 0, 1, 1], [], []>} : vector<128x4xbf16>, vector<4x8xbf16>, vector<128x8xf32> -> vector<128x8xf32>
    %64 = arith.addf %55, %63 : vector<128x8xf32>
    %c2_i32_46 = arith.constant 2 : i32
    %65 = arith.addi %0, %c2_i32_46 : i32
    %c0_47 = arith.constant 0 : index
    %66 = arith.index_cast %65 : i32 to index
    %c1_48 = arith.constant 1 : index
    %c0_49 = arith.constant 0 : index
    %67 = vector.load %arg2[%c0_47, %66, %c1_48, %c0_49] : memref<1x18x18x4xbf16, #tpu.memory_space<vmem>>, vector<1x8x16x4xbf16>
    %68 = vector.shape_cast %67 : vector<1x8x16x4xbf16> to vector<8x16x4xbf16>
    %69 = vector.shape_cast %68 : vector<8x16x4xbf16> to vector<128x4xbf16>
    %c7 = arith.constant 7 : index
    %c0_50 = arith.constant 0 : index
    %c0_51 = arith.constant 0 : index
    %70 = vector.load %arg3[%c7, %c0_50, %c0_51] : memref<9x4x8xbf16, #tpu.memory_space<vmem>>, vector<1x4x8xbf16>
    %71 = vector.shape_cast %70 : vector<1x4x8xbf16> to vector<4x8xbf16>
    %cst_52 = arith.constant dense<0.000000e+00> : vector<128x8xf32>
    %72 = tpu.matmul %69, %71, %cst_52 {dimension_numbers = #tpu.dot_dimension_numbers<[1], [0], [0], [1], [0, 0, 1, 1], [], []>} : vector<128x4xbf16>, vector<4x8xbf16>, vector<128x8xf32> -> vector<128x8xf32>
    %73 = arith.addf %64, %72 : vector<128x8xf32>
    %c2_i32_53 = arith.constant 2 : i32
    %74 = arith.addi %0, %c2_i32_53 : i32
    %c0_54 = arith.constant 0 : index
    %75 = arith.index_cast %74 : i32 to index
    %c2_55 = arith.constant 2 : index
    %c0_56 = arith.constant 0 : index
    %76 = vector.load %arg2[%c0_54, %75, %c2_55, %c0_56] : memref<1x18x18x4xbf16, #tpu.memory_space<vmem>>, vector<1x8x16x4xbf16>
    %77 = vector.shape_cast %76 : vector<1x8x16x4xbf16> to vector<8x16x4xbf16>
    %78 = vector.shape_cast %77 : vector<8x16x4xbf16> to vector<128x4xbf16>
    %c8 = arith.constant 8 : index
    %c0_57 = arith.constant 0 : index
    %c0_58 = arith.constant 0 : index
    %79 = vector.load %arg3[%c8, %c0_57, %c0_58] : memref<9x4x8xbf16, #tpu.memory_space<vmem>>, vector<1x4x8xbf16>
    %80 = vector.shape_cast %79 : vector<1x4x8xbf16> to vector<4x8xbf16>
    %cst_59 = arith.constant dense<0.000000e+00> : vector<128x8xf32>
    %81 = tpu.matmul %78, %80, %cst_59 {dimension_numbers = #tpu.dot_dimension_numbers<[1], [0], [0], [1], [0, 0, 1, 1], [], []>} : vector<128x4xbf16>, vector<4x8xbf16>, vector<128x8xf32> -> vector<128x8xf32>
    %82 = arith.addf %73, %81 : vector<128x8xf32>
    %c128_i32 = arith.constant 128 : i32
    %83 = arith.muli %arg1, %c128_i32 : i32
    %84 = tpu.assume_multiple %83, 128 : i32
    %85 = tpu.transpose %82, [1, 0] : vector<128x8xf32> -> vector<8x128xf32>
    %c0_60 = arith.constant 0 : index
    %c0_61 = arith.constant 0 : index
    %86 = arith.index_cast %84 : i32 to index
    %87 = vector.load %arg4[%c0_60, %c0_61, %86] : memref<1x8x256xf32, #tpu.memory_space<vmem>>, vector<1x8x128xf32>
    %88 = vector.shape_cast %87 : vector<1x8x128xf32> to vector<8x128xf32>
    %89 = vector.shape_cast %85 : vector<8x128xf32> to vector<1x8x128xf32>
    tpu.vector_store %arg4[%c0_60, %c0_61, %86], %89 {strides = array<i32>} : memref<1x8x256xf32, #tpu.memory_space<vmem>>, vector<1x8x128xf32>,
    %c1_i32_62 = arith.constant 1 : i32
    %90 = arith.cmpi eq, %arg1, %c1_i32_62 : i32
    %91 = arith.extui %90 : i1 to i32
    %c0_i32_63 = arith.constant 0 : i32
    %92 = arith.cmpi ne, %91, %c0_i32_63 : i32
    scf.if %92 {
      %c0_64 = arith.constant 0 : index
      %c0_65 = arith.constant 0 : index
      %c0_66 = arith.constant 0 : index
      %93 = vector.load %arg4[%c0_64, %c0_65, %c0_66] : memref<1x8x256xf32, #tpu.memory_space<vmem>>, vector<1x8x256xf32>
      %94 = vector.shape_cast %93 : vector<1x8x256xf32> to vector<8x256xf32>
      %cst_67 = arith.constant dense<0.000000e+00> : vector<8xf32>
      %95 = vector.multi_reduction <add>, %94, %cst_67 [1] : vector<8x256xf32> to vector<8xf32>
      %96 = vector.shape_cast %95 : vector<8xf32> to vector<8x1xf32>
      %cst_68 = arith.constant 3.906250e-03 : f32
      %97 = vector.broadcast %cst_68 : f32 to vector<8x1xf32>
      %98 = arith.mulf %96, %97 : vector<8x1xf32>
      %99 = vector.broadcast %98 : vector<8x1xf32> to vector<8x256xf32>
      %100 = arith.subf %94, %99 : vector<8x256xf32>
      %101 = arith.mulf %100, %100 : vector<8x256xf32>
      %cst_69 = arith.constant dense<0.000000e+00> : vector<8xf32>
      %102 = vector.multi_reduction <add>, %101, %cst_69 [1] : vector<8x256xf32> to vector<8xf32>
      %103 = vector.shape_cast %102 : vector<8xf32> to vector<8x1xf32>
      %cst_70 = arith.constant 3.906250e-03 : f32
      %104 = vector.broadcast %cst_70 : f32 to vector<8x1xf32>
      %105 = arith.mulf %103, %104 : vector<8x1xf32>
      %cst_71 = arith.constant 9.99999974E-6 : f32
      %106 = vector.broadcast %cst_71 : f32 to vector<8x1xf32>
      %107 = arith.addf %105, %106 : vector<8x1xf32>
      %108 = math.rsqrt %107 : vector<8x1xf32>
      %109 = vector.broadcast %108 : vector<8x1xf32> to vector<8x256xf32>
      %110 = arith.mulf %100, %109 : vector<8x256xf32>
      %cst_72 = arith.constant 0.000000e+00 : f32
      %111 = vector.broadcast %cst_72 : f32 to vector<8x256xf32>
      %112 = arith.cmpf oge, %110, %111 : vector<8x256xf32>
      %cst_73 = arith.constant 2.000000e-01 : f32
      %113 = vector.broadcast %cst_73 : f32 to vector<8x256xf32>
      %114 = arith.mulf %113, %110 : vector<8x256xf32>
      %115 = arith.select %112, %110, %114 : vector<8x256xi1>, vector<8x256xf32>
      %c0_74 = arith.constant 0 : index
      %c0_75 = arith.constant 0 : index
      %c0_76 = arith.constant 0 : index
      %116 = vector.load %arg4[%c0_74, %c0_75, %c0_76] : memref<1x8x256xf32, #tpu.memory_space<vmem>>, vector<1x8x256xf32>
      %117 = vector.shape_cast %116 : vector<1x8x256xf32> to vector<8x256xf32>
      %118 = vector.shape_cast %115 : vector<8x256xf32> to vector<1x8x256xf32>
      tpu.vector_store %arg4[%c0_74, %c0_75, %c0_76], %118 {strides = array<i32>} : memref<1x8x256xf32, #tpu.memory_space<vmem>>, vector<1x8x256xf32>,
    } else {
    }
    return
  }
  func.func @transform_0(%arg0: i32, %arg1: i32) -> (i32, i32, i32, i32) {
    %c0_i32 = arith.constant 0 : i32
    %c0_i32_0 = arith.constant 0 : i32
    %c0_i32_1 = arith.constant 0 : i32
    %c0_i32_2 = arith.constant 0 : i32
    return %arg0, %c0_i32, %c0_i32_0, %c0_i32_1 : i32, i32, i32, i32
  }
  func.func @transform_1(%arg0: i32, %arg1: i32) -> (i32, i32, i32) {
    %c0_i32 = arith.constant 0 : i32
    %c0_i32_0 = arith.constant 0 : i32
    %c0_i32_1 = arith.constant 0 : i32
    %c0_i32_2 = arith.constant 0 : i32
    return %c0_i32, %c0_i32_0, %c0_i32_1 : i32, i32, i32
  }
  func.func @transform_2(%arg0: i32, %arg1: i32) -> (i32, i32, i32) {
    %c0_i32 = arith.constant 0 : i32
    %c0_i32_0 = arith.constant 0 : i32
    %c0_i32_1 = arith.constant 0 : i32
    return %arg0, %c0_i32, %c0_i32_0 : i32, i32, i32
  }
}

</mosaic_0001>

<bundles_post_ra>
// kernel: conv_block_dis.1
= control target key start
LH: loop header
LB: loop body
LE: loop exit
PB: predicated region body
PF: predicated region fallthrough
CT: control target
= control target key end

     0   :  { %7 = vsyncpa [#allocation3], 0  ;;  %s4886_s0 = inlined_call_operand.hbm [shape: bf16[2,18,18,4], index: 0, kind: input, shape index: {}]   ;;  %s4887_s1 = inlined_call_operand.hbm [shape: bf16[9,4,8], index: 1, kind: input, shape index: {}]   ;;  %s4888_s2 = inlined_call_operand.hbm [shape: f32[2,8,256], index: 2, kind: output, shape index: {}]  }
   0x1   :  { %9 = vsyncpa [#allocation3 + $0x1], 0 }
   0x2   :  { %10 = vsyncpa [#allocation6], 0 }
   0x3   :  { %11 = vsyncpa [#allocation4], 0 }
   0x4   :  { %13 = vsyncpa [#allocation4 + $0x1], 0  ;;  %s3821_s9 = smov 0   ;;  %s3823_s10 = smov 0  }
   0x5   :  { %s3825_s11 = smov 0   ;;  %s3827_s12 = smov 0  }
   0x6   :  { %s3829_s13 = smov 0   ;;  %s3831_s14 = smov 0  }
   0x7   :  { %s3833_s15 = smov 0   ;;  %s3835_s16 = smov 0  }
   0x8 LB: > { %s2841_s17 = sadd.s32 4294967295, %s3797_s16   ;;  %s2842_s18 = sadd.s32 4294967294, %s3797_s16   ;;  %s3797_s16 = sphi %s3835_s16, %s19_s16   ;;  %s3793_s15 = sphi %s3833_s15, %s4926_s15   ;;  %s3789_s14 = sphi %s3831_s14, %s4925_s14   ;;  %s3785_s13 = sphi %s3829_s13, %s4924_s13   ;;  %s3781_s12 = sphi %s3827_s12, %s4923_s12   ;;  %s3777_s11 = sphi %s3825_s11, %s4922_s11   ;;  %s3773_s10 = sphi %s3823_s10, %s4921_s10   ;;  %s3769_s9 = sphi %s3821_s9, %s4920_s9  }
   0x9   : > { %p51_p0 = scmp.ne.s32.totalorder %s3773_s10, %s3769_s9  ;;  %p3865_p1 = scmp.eq.s32.totalorder %s2841_s17, 0 }
   0xa   : > { %p3869_p2 = scmp.eq.s32.totalorder %s2841_s17, 3  ;;  %p102_p3 = scmp.eq.s32.totalorder %s2842_s18, 3 }
   0xb   : > { %s4894_s19 = scalar_select %p3865_p1, 1, 0 }
   0xc   : > { %s4895_s20 = scalar_select %p3869_p2, 1, 0 }
   0xd   : > { %p3875_p4 = por %p3865_p1, %p51_p0  ;;  %p2843_p5 = scmp.ge.s32.totalorder %s3797_s16, 1 }
   0xe   : > { %p3880_p6 = por %p102_p3, %p51_p0  ;;  %p109_p7 = scmp.lt.s32.totalorder %s3797_s16, 5 }
   0xf   : > { %s4896_s21 = scalar_select %p3875_p4, 1, 0 }
  0x10   : > { %s4897_s22 = scalar_select %p3880_p6, 1, 0 }
  0x11   : > { %p3885_p8 = pnand %p2843_p5, %p109_p7  ;;  %s3799_s24 = smov [#allocation5]  }
  0x12   : > { %s121_s25 = sshll.u32 %s3799_s24, 4  ;;  %s3637_s29 = scalar_lea.hbm %s4887_s1, 288  ;;  %s122_s25 = int_to_ptr.vmem [resolvable:$true] %s121_s25 }
  0x13   : > { %s4898_s23 = scalar_select %p3885_p8, 1, 0 }
  0x14   : > { %p3525_p9 = pneg %p3885_p8  ;;  %p3638_p11 = scmp.ne.s32.totalorder %s4887_s1, %s3637_s29 }
  0x15   : > { %p3644_p3 = scmp.lt.u32.totalorder %s3637_s29, %s4887_s1 }
  0x16   : > { %p3893_p10 = pnand %p3525_p9, %p3865_p1 }
  0x18   : > { %p3639_p12 = pneg %p3893_p10 }
  0x1a   : > { %p3640_p13 = pnand %p3639_p12, %p3638_p11 }
  0x1c   : > { %p3641_p0 = pneg %p3640_p13 }
  0x1e   : > { %p3646_p5 = pnand %p3644_p3, %p3641_p0 }
  0x20   : > { %3649 = shalt.err (!%p3646_p5)
}
  0x21   : > { %s3650_s6 = scalar_lea.vmem %s122_s25, 288  ;;  %p3658_p1 = scmp.lt.s32.totalorder %s122_s25, %s122_s25 }
  0x22   : > { %p3651_p7 = scmp.ne.s32.totalorder %s122_s25, %s3650_s6  ;;  %p3659_p4 = scmp.lt.s32.totalorder %s3650_s6, %s3650_s6 }
  0x24   : > { %p3653_p9 = pnand %p3651_p7, %p3639_p12  ;;  %p3660_p8 = por %p3659_p4, %p3658_p1 }
  0x26   : > { %p3654_p6 = pneg %p3653_p9 }
  0x28   : > { %p3661_p2 = pnand %p3660_p8, %p3654_p6 }
  0x2a   : > { %3664 = shalt.err (!%p3661_p2)
}
  0x2b   : > { %s3800_s7 = smov 32   ;;  %s3801_s8 = smov 2  }
  0x2c   : > { %3528 = dma.hbm_to_vmem [thread:$0]  (!%p3893_p10), %s4887_s1, 288, %s122_s25, [#allocation6], %s3800_s7, %s3800_s7, %s3801_s8  }
  0x2d   : > { %s28_s24 = sadd.s32 1, %s3789_s14  ;;  %s31_s27 = sadd.s32 1, %s3793_s15 }
  0x2e   : > { %p29_p1 = scmp.ge.s32.totalorder %s28_s24, 2  ;;  %s38_s28 = sadd.s32 1, %s3777_s11 }
  0x2f   : > { %p45_p2 = scmp.ne.s32.totalorder %s3777_s11, %s3773_s10  ;;  %p46_p4 = scmp.eq.s32.totalorder %s3797_s16, 0 }
  0x30   : > { %s4928_s24 = smov (%p29_p1, %s28_s24), 0  ;;  %s4930_s27 = smov (!%p29_p1, %s31_s27), %s3793_s15 }
  0x31   : > { %p4900_p6 = scmp.ne.s32.totalorder %s4895_s20, 0  ;;  %p33_p11 = scmp.ge.s32.totalorder %s4930_s27, 2 }
  0x32   : > { %p3538_p10 = scmp.lt.s32.totalorder %s3797_s16, 4  ;;  %p47_p12 = por %p46_p4, %p45_p2 }
  0x33   : > { %p3924_p8 = por %p4900_p6, %p45_p2  ;;  %s135_s25 = sand.u32 1, %s3777_s11  }
  0x34   : > { %s4932_s27 = smov (%p33_p11, %s4930_s27), 0  ;;  %s3514_s29 = smul.u32 216, %s135_s25 }
  0x35   : > { %s35_s30 = ssub.s32 %s3793_s15, %s4932_s27  ;;  %s3515_s3 = smul.u32 3456, %s3793_s15 }
  0x36   : > { %p36_p13 = scmp.eq.s32.totalorder %s35_s30, 0  ;;  %s139_s6 = scalar_lea.vmem [#allocation2], %s3514_s29 }
  0x37   : > { %s3938_s20 = scalar_lea.hbm %s4886_s0, %s3515_s3  ;;  %s146_s7 = sshll.u32 %s139_s6, 4  ;;  %s3943_s7 = int_to_ptr.vmem [resolvable:$true] %s146_s7 }
  0x38   : > { %s3941_s8 = scalar_select %p36_p13, %s3777_s11, %s38_s28  }
  0x39   : > { %p3947_p0 = pnand %p3538_p10, %p47_p12  ;;  %s3951_s18 = scalar_lea.sflag [#allocation3], %s135_s25 }
  0x3a   : > { %s3665_s30 = scalar_lea.hbm %s3938_s20, 3456  ;;  %s3670_s3 = scalar_lea.hbm %s4886_s0, 6912 }
  0x3b   : > { %p3666_p3 = scmp.ne.s32.totalorder %s3938_s20, %s3665_s30  ;;  %p3667_p5 = pneg %p3947_p0 }
  0x3c   : > { %p3671_p1 = scmp.lt.u32.totalorder %s3938_s20, %s4886_s0  ;;  %p3672_p2 = scmp.lt.u32.totalorder %s3670_s3, %s3665_s30 }
  0x3d   : > { %p3668_p7 = pnand %p3667_p5, %p3666_p3  ;;  %p3674_p6 = scmp.lt.u32.totalorder %s3665_s30, %s3938_s20 }
  0x3e   : > { %p3673_p4 = por %p3672_p2, %p3671_p1 }
  0x3f   : > { %p3669_p9 = pneg %p3668_p7 }
  0x40   : > { %p3675_p11 = por %p3674_p6, %p3673_p4 }
  0x42   : > { %p3676_p10 = pnand %p3675_p11, %p3669_p9 }
  0x44   : > { %3679 = shalt.err (!%p3676_p10)
}
  0x45   : > { %s3680_s25 = scalar_lea.vmem %s3943_s7, 3456  ;;  %s3802_s6 = smov [#allocation2]  }
  0x46   : > { %p3681_p12 = scmp.ne.s32.totalorder %s3943_s7, %s3680_s25  ;;  %s3685_s28 = sshll.u32 %s3802_s6, 4  ;;  %s3686_s28 = int_to_ptr.vmem [resolvable:$false] %s3685_s28 }
  0x47   : > { %s3687_s29 = scalar_lea.vmem %s3686_s28, 6912  ;;  %p3688_p7 = scmp.lt.s32.totalorder %s3943_s7, %s3686_s28 }
  0x48   : > { %p3683_p13 = pnand %p3681_p12, %p3667_p5  ;;  %p3689_p1 = scmp.lt.s32.totalorder %s3687_s29, %s3680_s25 }
  0x4a   : > { %p3684_p3 = pneg %p3683_p13  ;;  %p3690_p2 = por %p3689_p1, %p3688_p7 }
  0x4c   : > { %p3691_p4 = pnand %p3690_p2, %p3684_p3 }
  0x4e   : > { %3694 = shalt.err (!%p3691_p4)
}
  0x4f   : > { %s3803_s30 = smov 64   ;;  %s3804_s3 = smov 4  }
  0x50   : > { %3532 = dma.hbm_to_vmem [thread:$0]  (!%p3947_p0), %s3938_s20, 3456, %s3943_s7, %s3951_s18, %s3803_s30, %s3803_s30, %s3804_s3  }
  0x51   : > { %p4903_p5 = scmp.ne.s32.totalorder %s4898_s23, 0 }
  0x53   : > { %158 = sbr.rel (%p4903_p5) target bundleno = 944 (0x3b0), region = 28 }
  0x5a   : > { %s3982_s4 = sand.u32 1, %s3773_s10   ;;  %p4904_p9 = scmp.ne.s32.totalorder %s4896_s21, 0 }
  0x5b   : > { %s3516_s5 = smul.u32 216, %s3982_s4  ;;  %s161_s25 = scalar_lea.sflag [#allocation3], %s3982_s4 }
  0x5d   : > { %s164_s6 = scalar_lea.vmem [#allocation2], %s3516_s5 }
  0x5e   : > { %3756 = dma.done.wait (%p4904_p9), %s161_s25, 3456  }
  0x5f   : > { %3758 = vsyncadd (%p4904_p9), %s161_s25, 4294963840  ;;  %p4905_p6 = scmp.ne.s32.totalorder %s4894_s19, 0 }
  0x61   : > { %3760 = dma.done.wait (%p4905_p6), [#allocation6], 288  }
  0x62   : > { %3762 = vsyncadd (%p4905_p6), [#allocation6], 4294967008  ;;  %s3129_s23 = smul.u32 96, %s3781_s12  ;;  %vm465_vm0 = vcmask 1041408   ;;  %vm219_vm1 = vsmask.f32 3328 }
  0x63   : > { %vm220_vm2 = vsmask.f32 7440  ;;  %v1398_v0 = vld [vmem:[#allocation5 + $0x8] sm:$0x3]  ;;  %v415_v1 = vld [vmem:[#allocation5 + $0x2] sm:$0x3] }
  0x64   : > { %s3995_s20 = scalar_lea.vmem %s164_s6, %s3129_s23 [#allocation2]  ;;  %3508 = vmatprep.subr.msk.bf16.mxu0 %vm465_vm0, %v1398_v0  ;;  %3504 = vmatprep.subr.msk.bf16.mxu1 %vm465_vm0, %v415_v1  ;;  %v4003_v3 = vsel %vm465_vm0, %v1398_v0, 0  ;;  %v467_v4 = vsel %vm465_vm0, %v415_v1, 0  ;;  %v4025_v19 = vld [vmem:[#allocation5 + $0xa] sm:$0x3]  ;;  %vm4037_vm3 = vmor %vm219_vm1, %vm220_vm2  ;;  %vm440_vm4 = vcmask 31744   ;;  %vm754_vm5 = vcmask 1042432  }
  0x65   : > { %v3998_v2 = vld [vmem:[%s3995_s20] sm:$0xf]  ;;  %v4007_v5 = vld [vmem:[%s3995_s20 + $0x4] sm:$0xf]  ;;  %v4010_v6 = vld [vmem:[%s3995_s20 + $0x8] sm:$0x1]  ;;  %3285 = vmatpush3.bf16.msra.mxu0 %v4003_v3  ;;  %3213 = vmatpush3.bf16.msra.mxu1 %v467_v4 }
  0x66   : > { %v223_v7 = vshrl.u32 %v3998_v2, 16  ;;  %v226_v8 = vshll.u32 %v3998_v2, 16  ;;  %v232_v9 = vshll.u32 %v4007_v5, 16  ;;  %v236_v10 = vshrl.u32 %v4007_v5, 16  ;;  %v2943_v11 = vld [vmem:[%s3995_s20 + $0xc] sm:$0xf]  ;;  %3510 = vmatprep.subr.msk.bf16.mxu0 %vm465_vm0, %v4025_v19 }
  0x67   : > { %v242_v12 = vshll.u32 %v4010_v6, 16  ;;  %v4020_v13 = vld [vmem:[%s3995_s20 + $0x10] sm:$0xf]  ;;  %v4023_v14 = vld [vmem:[%s3995_s20 + $0x14] sm:$0x1]  ;;  %v1206_v21 = vshrl.u32 %v2943_v11, 16 }
  0x68   : > { %v225_v15 = vrot.slane %v223_v7, 4  ;;  %v228_v16 = vrot.slane %v226_v8, 5  ;;  %v234_v17 = vrot.slane %v232_v9, 5  ;;  %v238_v18 = vrot.slane %v236_v10, 4  ;;  %v4033_v28 = vld [vmem:[%s3995_s20 + $0xc] sm:$0xf] }
  0x69   : > { %v244_v20 = vrot.slane %v242_v12, 5  ;;  %v1209_v22 = vshll.u32 %v2943_v11, 16  ;;  %v1215_v23 = vshll.u32 %v4020_v13, 16  ;;  %v1219_v26 = vshrl.u32 %v4020_v13, 16  ;;  %v4042_v33 = vld [vmem:[%s3995_s20 + $0x10] sm:$0xf] }
  0x6a   : > { %v229_v24 = vor.u32 %v228_v16, %v225_v15  ;;  %v239_v25 = vor.u32 %v238_v18, %v234_v17  ;;  %v1225_v27 = vshll.u32 %v4023_v14, 16  ;;  %v1208_v30 = vrot.slane %v1206_v21, 4  ;;  %v4045_v39 = vld [vmem:[%s3995_s20 + $0x14] sm:$0x1]  ;;  %v2946_v50 = vld [vmem:[%s3995_s20 + $0x18] sm:$0xf] }
  0x6b   : > { %v1211_v31 = vrot.slane %v1209_v22, 5  ;;  %v1217_v32 = vrot.slane %v1215_v23, 5  ;;  %v1221_v36 = vrot.slane %v1219_v26, 4  ;;  %v247_v40 = vshrl.u32 %v4033_v28, 16  ;;  %v4058_v55 = vld [vmem:[%s3995_s20 + $0x1c] sm:$0xf] }
  0x6c   : > { %v230_v34 = vrot.slane %v229_v24, 4  ;;  %v240_v35 = vrot.slane %v239_v25, 4  ;;  %v1227_v38 = vrot.slane %v1225_v27, 5  ;;  %v250_v41 = vshll.u32 %v4033_v28, 16  ;;  %v4066_v60 = vld [vmem:[%s3995_s20 + $0x20] sm:$0x1] }
  0x6d   : > { %v1212_v37 = vor.u32 %v1211_v31, %v1208_v30  ;;  %v1222_v44 = vor.u32 %v1221_v36, %v1217_v32  ;;  %v256_v45 = vshll.u32 %v4042_v33, 16  ;;  %v249_v48 = vrot.slane %v247_v40, 4  ;;  %v4074_v15 = vld [vmem:[%s3995_s20 + $0x18] sm:$0xf]  ;;  %v4081_v21 = vld [vmem:[%s3995_s20 + $0x1c] sm:$0xf] }
  0x6e   : > { %v235_v42 = vsel %vm4037_vm3, %v230_v34, %v234_v17  ;;  %v245_v43 = vsel %vm4037_vm3, %v240_v35, %v244_v20  ;;  %v252_v49 = vrot.slane %v250_v41, 5  ;;  %v260_v53 = vshrl.u32 %v4042_v33, 16  ;;  %v4091_v31 = vld [vmem:[%s3995_s20 + $0x20] sm:$0x1]  ;;  %s3121_s19 = sshll.u32 %s3781_s12, 7  ;;  %s2849_s21 = sshll.u32 %s3982_s4, 4 }
  0x6f   : > { %v2853_v46 = vcombine.low %v235_v42, %v245_v43  ;;  %v1213_v47 = vrot.slane %v1212_v37, 4  ;;  %v1223_v51 = vrot.slane %v1222_v44, 4  ;;  %v258_v52 = vrot.slane %v256_v45, 5  ;;  %s2688_s7 = sshra.s32 %s3121_s19, 7  ;;  %s4825_s18 = scalar_lea.vmem [#allocation7], %s2849_s21 }
  0x70   : > { %v266_v54 = vshll.u32 %v4045_v39, 16  ;;  %v1597_v57 = vrot.slane %v4020_v13, 5  ;;  %v1600_v58 = vrot.slane %v4023_v14, 5  ;;  %v253_v59 = vor.u32 %v252_v49, %v249_v48  ;;  %v4104_v48 = vld [vmem:[#allocation5] sm:$0x3]  ;;  %s3122_s17 = sshll.u32 %s2688_s7, 3 }
  0x71   : > { %3214 = vmatprep.mubr.msk.bf16.mxu1 %vm440_vm4, %v2853_v46  ;;  %v1218_v56 = vsel %vm4037_vm3, %v1213_v47, %v1217_v32  ;;  %v1228_v61 = vsel %vm4037_vm3, %v1223_v51, %v1227_v38  ;;  %v262_v62 = vrot.slane %v260_v53, 4  ;;  %v1230_v0 = vshrl.u32 %v2946_v50, 16  ;;  %v2949_v38 = vld [vmem:[%s3995_s20 + $0x24] sm:$0xf]  ;;  %v4110_v51 = vld [vmem:[%s3995_s20 + $0x2c] sm:$0x1]  ;;  %3505 = vmatprep.subr.msk.bf16.mxu1 %vm465_vm0, %v4104_v48  ;;  %s2691_s28 = scalar_lea.vmem %s4825_s18, %s3122_s17 [#allocation7] }
  0x72   : > { %v268_v63 = vrot.slane %v266_v54, 5  ;;  %v2967_v1 = vcombine.low %v1218_v56, %v1228_v61  ;;  %v254_v4 = vrot.slane %v253_v59, 4  ;;  %v1233_v7 = vshll.u32 %v2946_v50, 16  ;;  %p3123_p0 = scmp.ne.s32.totalorder %s3781_s12, 1 }
  0x73   : > { %v1239_v8 = vshll.u32 %v4058_v55, 16  ;;  %v263_v9 = vor.u32 %v262_v62, %v258_v52  ;;  %v1232_v10 = vrot.slane %v1230_v0, 4  ;;  %v1243_v11 = vshrl.u32 %v4058_v55, 16  ;;  %v4118_v62 = vld [vmem:[%s3995_s20 + $0x24] sm:$0xf] }
  0x74   : > { %v1249_v12 = vshll.u32 %v4066_v60, 16  ;;  %3286 = vmatprep.mubr.msk.bf16.mxu0 %vm440_vm4, %v2967_v1  ;;  %v259_v16 = vsel %vm4037_vm3, %v254_v4, %v258_v52  ;;  %v1235_v17 = vrot.slane %v1233_v7, 5  ;;  %v1604_v20 = vrot.slane %v4058_v55, 5  ;;  %v4121_v7 = vld [vmem:[%s3995_s20 + $0x28] sm:$0xf] }
  0x75   : > { %v1241_v18 = vrot.slane %v1239_v8, 5  ;;  %v264_v22 = vrot.slane %v263_v9, 4  ;;  %v1245_v23 = vrot.slane %v1243_v11, 4  ;;  %v1607_v25 = vrot.slane %v4066_v60, 5 }
  0x76   : > { %v1251_v24 = vrot.slane %v1249_v12, 5  ;;  %v1236_v26 = vor.u32 %v1235_v17, %v1232_v10  ;;  %v4086_v27 = vrot.slane %v1604_v20, 4  ;;  %v1702_v30 = vsel %vm465_vm0, %v4025_v19, 0  ;;  %v4101_v19 = vld [vmem:[%s3995_s20 + $0x28] sm:$0xf] }
  0x77   : > { %v271_v32 = vshrl.u32 %v4074_v15, 16  ;;  %v269_v34 = vsel %vm4037_vm3, %v264_v22, %v268_v63  ;;  %v1246_v35 = vor.u32 %v1245_v23, %v1241_v18  ;;  %v274_v36 = vshll.u32 %v4074_v15, 16  ;;  %v4125_v12 = vld [vmem:[#allocation5 + $0xc] sm:$0x3] }
  0x78   : > { %v280_v37 = vshll.u32 %v4081_v21, 16  ;;  %v2854_v40 = vcombine.low %v259_v16, %v269_v34  ;;  %v1237_v41 = vrot.slane %v1236_v26, 4  ;;  %v284_v43 = vshrl.u32 %v4081_v21, 16 }
  0x79   : > { %v273_v42 = vrot.slane %v271_v32, 4  ;;  %v1247_v44 = vrot.slane %v1246_v35, 4  ;;  %v276_v45 = vrot.slane %v274_v36, 5  ;;  %v290_v47 = vshll.u32 %v4091_v31, 16  ;;  %v2952_v35 = vld [vmem:[%s3995_s20 + $0x30] sm:$0xf] }
  0x7a   : > { %v282_v46 = vrot.slane %v280_v37, 5  ;;  %3215 = vmatmul.mubr.msk.bf16.vlgmr.msra.gmra.mrb[0].mxu1 %vm440_vm4, %v2854_v40  ;;  %v1242_v49 = vsel %vm4037_vm3, %v1237_v41, %v1241_v18  ;;  %v286_v50 = vrot.slane %v284_v43, 4  ;;  %v1254_v52 = vshrl.u32 %v2949_v38, 16  ;;  %v4129_v18 = vld [vmem:[%s3995_s20 + $0x2c] sm:$0x1] }
  0x7b   : > { %v1257_v53 = vshll.u32 %v2949_v38, 16  ;;  %v1252_v54 = vsel %vm4037_vm3, %v1247_v44, %v1251_v24  ;;  %v277_v56 = vor.u32 %v276_v45, %v273_v42  ;;  %v292_v59 = vrot.slane %v290_v47, 5  ;;  %v4140_v41 = vld [vmem:[%s3995_s20 + $0x34] sm:$0xf] }
  0x7c   : > { %v1263_v61 = vshll.u32 %v4101_v19, 16  ;;  %v2968_v63 = vcombine.low %v1242_v49, %v1252_v54  ;;  %v287_v0 = vor.u32 %v286_v50, %v282_v46  ;;  %v1256_v1 = vrot.slane %v1254_v52, 4 }
  0x7d   : > { %v1259_v4 = vrot.slane %v1257_v53, 5  ;;  %v278_v8 = vrot.slane %v277_v56, 4  ;;  %v1267_v10 = vshrl.u32 %v4101_v19, 16  ;;  %v1273_v11 = vshll.u32 %v4110_v51, 16  ;;  %v4150_v53 = vld [vmem:[%s3995_s20 + $0x38] sm:$0x1] }
  0x7e   : > { %v1265_v9 = vrot.slane %v1263_v61, 5  ;;  %3287 = vmatmul.mubr.msk.bf16.vlgmr.msra.gmra.mrb[0].mxu0 %vm440_vm4, %v2968_v63  ;;  %v288_v16 = vrot.slane %v287_v0, 4  ;;  %v295_v22 = vshrl.u32 %v4118_v62, 16  ;;  %v298_v23 = vshll.u32 %v4118_v62, 16 }
  0x7f   : > { %v1260_v17 = vor.u32 %v1259_v4, %v1256_v1  ;;  %3303 = vmatpush3.bf16.msra.mxu0 %v1702_v30  ;;  %v283_v24 = vsel %vm4037_vm3, %v278_v8, %v282_v46  ;;  %v1269_v26 = vrot.slane %v1267_v10, 4  ;;  %v1275_v32 = vrot.slane %v1273_v11, 5  ;;  %v4155_v1 = vld [vmem:[%s3995_s20 + $0x30] sm:$0xf]  ;;  %v4160_v11 = vld [vmem:[%s3995_s20 + $0x34] sm:$0xf] }
  0x80   : > { %v304_v34 = vshll.u32 %v4121_v7, 16  ;;  %vm755_vm6 = vcmask 1046532   ;;  %v293_v36 = vsel %vm4037_vm3, %v288_v16, %v292_v59  ;;  %v297_v38 = vrot.slane %v295_v22, 4  ;;  %3511 = vmatprep.subr.msk.bf16.mxu0 %vm465_vm0, %v4125_v12 }
  0x81   : > { %v1261_v37 = vrot.slane %v1260_v17, 4  ;;  %v300_v40 = vrot.slane %v298_v23, 5  ;;  %v2855_v30 = vcombine.low %v283_v24, %v293_v36  ;;  %v1270_v42 = vor.u32 %v1269_v26, %v1265_v9  ;;  %vm4181_vm7 = vmor %vm754_vm5, %vm755_vm6 }
  0x82   : > { %v306_v43 = vrot.slane %v304_v34, 5  ;;  %v308_v44 = vshrl.u32 %v4121_v7, 16  ;;  %v314_v47 = vshll.u32 %v4129_v18, 16  ;;  %v1278_v49 = vshrl.u32 %v2952_v35, 16  ;;  %v4166_v34 = vld [vmem:[%s3995_s20 + $0x38] sm:$0x1] }
  0x83   : > { %v1266_v45 = vsel %vm4037_vm3, %v1261_v37, %v1265_v9  ;;  %v301_v46 = vor.u32 %v300_v40, %v297_v38  ;;  %3218 = vmatprep.mubr.msk.bf16.mxu1 %vm440_vm4, %v2855_v30  ;;  %v1271_v50 = vrot.slane %v1270_v42, 4  ;;  %v1281_v54 = vshll.u32 %v2952_v35, 16  ;;  %v2983_v30 = vld [vmem:[%s3995_s20 + $0xc] sm:$0xe] }
  0x84   : > { %v310_v52 = vrot.slane %v308_v44, 4  ;;  %v1287_v56 = vshll.u32 %v4140_v41, 16  ;;  %v316_v61 = vrot.slane %v314_v47, 5  ;;  %v1280_v63 = vrot.slane %v1278_v49, 4 }
  0x85   : > { %v302_v59 = vrot.slane %v301_v46, 4  ;;  %v1291_v0 = vshrl.u32 %v4140_v41, 16  ;;  %v1276_v4 = vsel %vm4037_vm3, %v1271_v50, %v1275_v32  ;;  %v1283_v9 = vrot.slane %v1281_v54, 5  ;;  %v4177_v46 = vld [vmem:[%s3995_s20 + $0x3c] sm:$0xf] }
  0x86   : > { %v311_v8 = vor.u32 %v310_v52, %v306_v43  ;;  %v1289_v10 = vrot.slane %v1287_v56, 5  ;;  %v2969_v16 = vcombine.low %v1266_v45, %v1276_v4  ;;  %v1297_v23 = vshll.u32 %v4150_v53, 16 }
  0x87   : > { %v307_v17 = vsel %vm4037_vm3, %v302_v59, %v306_v43  ;;  %v1293_v22 = vrot.slane %v1291_v0, 4  ;;  %v1284_v26 = vor.u32 %v1283_v9, %v1280_v63  ;;  %v319_v32 = vshrl.u32 %v4155_v1, 16  ;;  %v4189_v0 = vld [vmem:[%s3995_s20 + $0x40] sm:$0xf] }
  0x88   : > { %v312_v24 = vrot.slane %v311_v8, 4  ;;  %v322_v35 = vshll.u32 %v4155_v1, 16  ;;  %3290 = vmatprep.mubr.msk.bf16.mxu0 %vm440_vm4, %v2969_v16  ;;  %v1299_v37 = vrot.slane %v1297_v23, 5  ;;  %v328_v38 = vshll.u32 %v4160_v11, 16  ;;  %v4197_v16 = vld [vmem:[%s3995_s20 + $0x44] sm:$0x1] }
  0x89   : > { %v1294_v36 = vor.u32 %v1293_v22, %v1289_v10  ;;  %v332_v40 = vshrl.u32 %v4160_v11, 16  ;;  %v1285_v43 = vrot.slane %v1284_v26, 4  ;;  %v321_v44 = vrot.slane %v319_v32, 4 }
  0x8a   : > { %v317_v42 = vsel %vm4037_vm3, %v312_v24, %v316_v61  ;;  %v324_v45 = vrot.slane %v322_v35, 5  ;;  %v330_v50 = vrot.slane %v328_v38, 5  ;;  %v338_v61 = vshll.u32 %v4166_v34, 16  ;;  %v4211_v38 = vld [vmem:[%s3995_s20 + $0x48] sm:$0xf] }
  0x8b   : > { %v2856_v47 = vcombine.low %v307_v17, %v317_v42  ;;  %v1295_v49 = vrot.slane %v1294_v36, 4  ;;  %v334_v52 = vrot.slane %v332_v40, 4  ;;  %v1290_v56 = vsel %vm4037_vm3, %v1285_v43, %v1289_v10  ;;  %v2984_v17 = vld [vmem:[%s3995_s20 + $0x18] sm:$0xe]  ;;  %v4213_v40 = vld [vmem:[#allocation5 + $0x4] sm:$0x3] }
  0x8c   : > { %v325_v59 = vor.u32 %v324_v45, %v321_v44  ;;  %v2991_v63 = vrot.slane %v2983_v30, 9  ;;  %v1599_v9 = vrot.slane %v1597_v57, 4  ;;  %v343_v10 = vshrl.u32 %v4177_v46, 16  ;;  %v4221_v42 = vld [vmem:[%s3995_s20 + $0x4c] sm:$0xf] }
  0x8d   : > { %3219 = vmatmul.mubr.msk.bf16.gmra.mrb[4].mxu1 %vm440_vm4, %v2856_v47  ;;  %v1300_v4 = vsel %vm4037_vm3, %v1295_v49, %v1299_v37  ;;  %v335_v8 = vor.u32 %v334_v52, %v330_v50  ;;  %v340_v24 = vrot.slane %v338_v61, 5  ;;  %v346_v37 = vshll.u32 %v4177_v46, 16  ;;  %v4229_v47 = vld [vmem:[%s3995_s20 + $0x50] sm:$0x1] }
  0x8e   : > { %v2970_v22 = vcombine.low %v1290_v56, %v1300_v4  ;;  %v326_v23 = vrot.slane %v325_v59, 4  ;;  %v1598_v26 = vsel %vm4181_vm7, %v2991_v63, %v1597_v57  ;;  %v1601_v35 = vsel %vm4181_vm7, %v1599_v9, %v1600_v58  ;;  %v2985_v59 = vld [vmem:[%s3995_s20 + $0x24] sm:$0xe] }
  0x8f   : > { %v336_v32 = vrot.slane %v335_v8, 4  ;;  %v345_v36 = vrot.slane %v343_v10, 4  ;;  %v2999_v57 = vcombine.low %v1598_v26, %v1601_v35  ;;  %v352_v14 = vshll.u32 %v4189_v0, 16 }
  0x90   : > { %3291 = vmatmul.mubr.msk.bf16.gmra.mrb[4].mxu0 %vm440_vm4, %v2970_v22  ;;  %v331_v13 = vsel %vm4037_vm3, %v326_v23, %v330_v50  ;;  %v356_v30 = vshrl.u32 %v4189_v0, 16  ;;  %v348_v43 = vrot.slane %v346_v37, 5  ;;  %v362_v44 = vshll.u32 %v4197_v16, 16 }
  0x91   : > { %v341_v58 = vsel %vm4037_vm3, %v336_v32, %v340_v24  ;;  %v631_v45 = vsel %vm465_vm0, %v4104_v48, 0  ;;  %3304 = vmatprep.mubr.msk.bf16.mxu0 %vm440_vm4, %v2999_v57  ;;  %v354_v50 = vrot.slane %v352_v14, 5  ;;  %v2992_v56 = vrot.slane %v2984_v17, 9  ;;  %v4256_v32 = vld [vmem:[%s3995_s20 + $0x58] sm:$0xf] }
  0x92   : > { %v2857_v49 = vcombine.low %v331_v13, %v341_v58  ;;  %v358_v52 = vrot.slane %v356_v30, 4  ;;  %3231 = vmatpush3.bf16.msra.mxu1 %v631_v45  ;;  %v349_v61 = vor.u32 %v348_v43, %v345_v36  ;;  %v364_v63 = vrot.slane %v362_v44, 5  ;;  %v4267_v43 = vld [vmem:[%s3995_s20 + $0x5c] sm:$0x1] }
  0x93   : > { %v1608_v4 = vsel %vm4181_vm7, %v4086_v27, %v1607_v25  ;;  %v1904_v48 = vsel %vm465_vm0, %v4125_v12, 0  ;;  %3506 = vmatprep.subr.msk.bf16.mxu1 %vm465_vm0, %v4213_v40  ;;  %v1605_v9 = vsel %vm4181_vm7, %v2992_v56, %v1604_v20  ;;  %v367_v60 = vshrl.u32 %v4211_v38, 16  ;;  %v4250_v25 = vld [vmem:[%s3995_s20 + $0x54] sm:$0xf]  ;;  %v4258_v20 = vld [vmem:[#allocation5 + $0xe] sm:$0x3] }
  0x94   : > { %3222 = vmatprep.mubr.msk.bf16.mxu1 %vm440_vm4, %v2857_v49  ;;  %v359_v8 = vor.u32 %v358_v52, %v354_v50  ;;  %v370_v10 = vshll.u32 %v4211_v38, 16  ;;  %v350_v27 = vrot.slane %v349_v61, 4  ;;  %v3000_v12 = vcombine.low %v1605_v9, %v1608_v4 }
  0x95   : > { %v376_v17 = vshll.u32 %v4221_v42, 16  ;;  %v380_v22 = vshrl.u32 %v4221_v42, 16  ;;  %v369_v24 = vrot.slane %v367_v60, 4  ;;  %v386_v55 = vshll.u32 %v4229_v47, 16 }
  0x96   : > { %v360_v23 = vrot.slane %v359_v8, 4  ;;  %v372_v26 = vrot.slane %v370_v10, 5  ;;  %v355_v35 = vsel %vm4037_vm3, %v350_v27, %v354_v50  ;;  %v2993_v13 = vrot.slane %v2985_v59, 9  ;;  %v2987_v27 = vld [vmem:[%s3995_s20 + $0x3c] sm:$0xe] }
  0x97   : > { %v378_v36 = vrot.slane %v376_v17, 5  ;;  %v382_v37 = vrot.slane %v380_v22, 4  ;;  %v388_v30 = vrot.slane %v386_v55, 5  ;;  %v1611_v58 = vrot.slane %v4101_v19, 5 }
  0x98   : > { %v365_v57 = vsel %vm4037_vm3, %v360_v23, %v364_v63  ;;  %3305 = vmatmul.mubr.msk.bf16.vlgmr.msra.gmra.mrb[0].mxu0 %vm440_vm4, %v3000_v12  ;;  %v373_v14 = vor.u32 %v372_v26, %v369_v24  ;;  %v1614_v49 = vrot.slane %v4110_v51, 5  ;;  %v391_v50 = vshrl.u32 %v4250_v25, 16  ;;  %v2986_v63 = vld [vmem:[%s3995_s20 + $0x30] sm:$0xe]  ;;  %v4289_v24 = vld [vmem:[%s3995_s20 + $0x40] sm:$0xf] }
  0x99   : > { %v2858_v44 = vcombine.low %v355_v35, %v365_v57  ;;  %3321 = vmatpush3.bf16.msra.mxu0 %v1904_v48  ;;  %v383_v45 = vor.u32 %v382_v37, %v378_v36  ;;  %v1612_v56 = vsel %vm4181_vm7, %v2993_v13, %v1611_v58  ;;  %v1613_v59 = vrot.slane %v1611_v58, 4  ;;  %v4292_v26 = vld [vmem:[%s3995_s20 + $0x44] sm:$0x1] }
  0x9a   : > { %v374_v52 = vrot.slane %v373_v14, 4  ;;  %v394_v61 = vshll.u32 %v4250_v25, 16  ;;  %3512 = vmatprep.subr.msk.bf16.mxu0 %vm465_vm0, %v4258_v20  ;;  %v393_v51 = vrot.slane %v391_v50, 4  ;;  %v400_v4 = vshll.u32 %v4256_v32, 16 }
  0x9b   : > { %3223 = vmatmul.mubr.msk.bf16.gmra.mrb[8].mxu1 %vm440_vm4, %v2858_v44  ;;  %v384_v19 = vrot.slane %v383_v45, 4  ;;  %v404_v48 = vshrl.u32 %v4256_v32, 16  ;;  %v1615_v9 = vsel %vm4181_vm7, %v1613_v59, %v1614_v49  ;;  %v410_v10 = vshll.u32 %v4267_v43, 16  ;;  %v4307_v59 = vld [vmem:[%s3995_s20 + $0x4c] sm:$0xf] }
  0x9c   : > { %v379_v8 = vsel %vm4037_vm3, %v374_v52, %v378_v36  ;;  %v396_v60 = vrot.slane %v394_v61, 5  ;;  %v3001_v17 = vcombine.low %v1612_v56, %v1615_v9  ;;  %v402_v22 = vrot.slane %v400_v4, 5  ;;  %v2988_v61 = vld [vmem:[%s3995_s20 + $0x48] sm:$0xe]  ;;  %v4317_v4 = vld [vmem:[%s3995_s20 + $0x50] sm:$0x1] }
  0x9d   : > { %v389_v12 = vsel %vm4037_vm3, %v384_v19, %v388_v30  ;;  %v406_v23 = vrot.slane %v404_v48, 4  ;;  %v412_v36 = vrot.slane %v410_v10, 5  ;;  %v2994_v37 = vrot.slane %v2986_v63, 9  ;;  %v2989_v48 = vld [vmem:[%s3995_s20 + $0x54] sm:$0xe] }
  0x9e   : > { %v2859_v55 = vcombine.low %v379_v8, %v389_v12  ;;  %v397_v35 = vor.u32 %v396_v60, %v393_v51  ;;  %3308 = vmatprep.mubr.msk.bf16.mxu0 %vm440_vm4, %v3001_v17  ;;  %v1618_v57 = vrot.slane %v4140_v41, 5  ;;  %v1621_v14 = vrot.slane %v4150_v53, 5  ;;  %v4323_v10 = vld [vmem:[%s3995_s20 + $0x58] sm:$0xf] }
  0x9f   : > { %v407_v13 = vor.u32 %v406_v23, %v402_v22  ;;  %v2995_v30 = vrot.slane %v2987_v27, 9  ;;  %v1625_v44 = vrot.slane %v4289_v24, 5  ;;  %v1628_v45 = vrot.slane %v4292_v26, 5  ;;  %v4326_v27 = vld [vmem:[%s3995_s20 + $0x5c] sm:$0x1] }
  0xa0   : > { %3226 = vmatprep.mubr.msk.bf16.mxu1 %vm440_vm4, %v2859_v55  ;;  %v398_v58 = vrot.slane %v397_v35, 4  ;;  %v1619_v50 = vsel %vm4181_vm7, %v2994_v37, %v1618_v57  ;;  %v1620_v52 = vrot.slane %v1618_v57, 4  ;;  %v2869_v51 = vcombine.low %v3998_v2, %v4007_v5  ;;  %v4330_v23 = vld [vmem:[%s3995_s20 + $0x64] sm:$0xf]  ;;  %v2990_v57 = vld [vmem:[%s3995_s20 + $0x60] sm:$0xe] }
  0xa1   : > { %v408_v49 = vrot.slane %v407_v13, 4  ;;  %v1626_v53 = vsel %vm4181_vm7, %v2995_v30, %v1625_v44  ;;  %v1627_v56 = vrot.slane %v1625_v44, 4  ;;  %v2996_v17 = vrot.slane %v2988_v61, 9 }
  0xa2   : > { %v403_v41 = vsel %vm4037_vm3, %v398_v58, %v402_v22  ;;  %v1622_v19 = vsel %vm4181_vm7, %v1620_v52, %v1621_v14  ;;  %v1632_v22 = vrot.slane %v4307_v59, 5  ;;  %v1635_v2 = vrot.slane %v4317_v4, 5  ;;  %v4343_v14 = vld [vmem:[%s3995_s20 + $0x68] sm:$0x1] }
  0xa3   : > { %v413_v63 = vsel %vm4037_vm3, %v408_v49, %v412_v36  ;;  %v3002_v9 = vcombine.low %v1619_v50, %v1622_v19  ;;  %v1629_v60 = vsel %vm4181_vm7, %v1627_v56, %v1628_v45  ;;  %v2997_v55 = vrot.slane %v2989_v48, 9  ;;  %4910 = vst [vmem:[#allocation11_spill] sm:$0xff] %v4343_v14  ;;  %v732_v56 = vld [vmem:[%s3995_s20 + $0x18] sm:$0xe] }
  0xa4   : > { %v2860_v8 = vcombine.low %v403_v41, %v413_v63  ;;  %v3003_v12 = vcombine.low %v1626_v53, %v1629_v60  ;;  %v1633_v35 = vsel %vm4181_vm7, %v2996_v17, %v1632_v22  ;;  %v1634_v36 = vrot.slane %v1632_v22, 4  ;;  %v731_v53 = vld [vmem:[%s3995_s20 + $0xc] sm:$0xe]  ;;  %v734_v60 = vld [vmem:[%s3995_s20 + $0x30] sm:$0xe] }
  0xa5   : > { %3309 = vmatmul.mubr.msk.bf16.gmra.mrb[4].mxu0 %vm440_vm4, %v3002_v9  ;;  %v1639_v37 = vrot.slane %v4323_v10, 5  ;;  %v1642_v13 = vrot.slane %v4326_v27, 5  ;;  %v1646_v30 = vrot.slane %v4330_v23, 5  ;;  %v766_v49 = vrot.slane %v4042_v33, 5  ;;  %v733_v9 = vld [vmem:[%s3995_s20 + $0x24] sm:$0xe] }
  0xa6   : > { %3227 = vmatmul.mubr.msk.bf16.gmra.mrb[12].mxu1 %vm440_vm4, %v2860_v8  ;;  %3312 = vmatprep.mubr.msk.bf16.mxu0 %vm440_vm4, %v3003_v12  ;;  %v1636_v58 = vsel %vm4181_vm7, %v1634_v36, %v1635_v2  ;;  %v2870_v50 = vcombine.low %v4033_v28, %v4042_v33  ;;  %v2998_v41 = vrot.slane %v2990_v57, 9  ;;  %v2871_v61 = vcombine.low %v4074_v15, %v4081_v21  ;;  %v4365_v12 = vld [vmem:[#allocation5 + $0x6] sm:$0x3] }
  0xa7   : > { %3232 = vmatprep.mubr.msk.bf16.mxu1 %vm440_vm4, %v2869_v51  ;;  %v1640_v44 = vsel %vm4181_vm7, %v2997_v55, %v1639_v37  ;;  %v1641_v45 = vrot.slane %v1639_v37, 4  ;;  %v3004_v52 = vcombine.low %v1633_v35, %v1636_v58  ;;  %v1648_v19 = vrot.slane %v1646_v30, 4 }
  0xa8   : > { %v1649_v51 = vrot.slane %v4343_v14, 5  ;;  %v769_v48 = vrot.slane %v4045_v39, 5  ;;  %v864_v28 = vsel %vm465_vm0, %v4213_v40, 0  ;;  %v2886_v33 = vrot.slane %v731_v53, 9  ;;  %v4600_v14 = vld [vmem:[%s3995_s20 + $0x64] sm:$0xf] }
  0xa9   : > { %v1643_v63 = vsel %vm4181_vm7, %v1641_v45, %v1642_v13  ;;  %v768_v15 = vrot.slane %v766_v49, 4  ;;  %v2887_v17 = vrot.slane %v732_v56, 9  ;;  %v773_v22 = vrot.slane %v4081_v21, 5  ;;  %v735_v56 = vld [vmem:[%s3995_s20 + $0x3c] sm:$0xe] }
  0xaa   : > { %v3005_v8 = vcombine.low %v1640_v44, %v1643_v63  ;;  %v776_v2 = vrot.slane %v4091_v31, 5  ;;  %v1647_v39 = vsel %vm4181_vm7, %v2998_v41, %v1646_v30  ;;  %v1650_v40 = vsel %vm4181_vm7, %v1648_v19, %v1649_v51 }
  0xab   : > { %v4379_v55 = vsel %vm4181_vm7, %v2886_v33, %v766_v49  ;;  %v2888_v35 = vrot.slane %v733_v9, 9  ;;  %v4383_v21 = vsel %vm4181_vm7, %v768_v15, %v769_v48  ;;  %v4387_v31 = vsel %vm4181_vm7, %v2887_v17, %v773_v22  ;;  %v3617_v15 = vld [vmem:[%s3995_s20 + $0x24] sm:$0xff]   ;;  %v3049_v17 = vld [vmem:[%s3995_s20 + $0x18] sm:$0xf] }
  0xac   : > { %v775_v36 = vrot.slane %v773_v22, 4  ;;  %v780_v37 = vrot.slane %v4121_v7, 5  ;;  %v2872_v13 = vcombine.low %v4118_v62, %v4121_v7  ;;  %v2894_v57 = vcombine.low %v4379_v55, %v4383_v21  ;;  %v3615_v7 = vld [vmem:[%s3995_s20 + $0x18] sm:$0xff]  }
  0xad   : > { %3313 = vmatmul.mubr.msk.bf16.gmra.mrb[8].mxu0 %vm440_vm4, %v3004_v52  ;;  %v783_v30 = vrot.slane %v4129_v18, 5  ;;  %v2889_v58 = vrot.slane %v734_v60, 9  ;;  %v3006_v44 = vcombine.low %v1647_v39, %v1650_v40  ;;  %v2873_v62 = vcombine.low %v4155_v1, %v4160_v11  ;;  %v736_v40 = vld [vmem:[%s3995_s20 + $0x48] sm:$0xe] }
  0xae   : > { %3233 = vmatmul.mubr.msk.bf16.vlgmr.msra.gmra.mrb[0].mxu1 %vm440_vm4, %v2870_v50  ;;  %3316 = vmatprep.mubr.msk.bf16.mxu0 %vm440_vm4, %v3005_v8  ;;  %v4399_v45 = vsel %vm4181_vm7, %v775_v36, %v776_v2  ;;  %v4403_v49 = vsel %vm4181_vm7, %v2888_v35, %v780_v37  ;;  %v782_v50 = vrot.slane %v780_v37, 4  ;;  %v787_v52 = vrot.slane %v4160_v11, 5  ;;  %v730_v8 = vld [vmem:[%s3995_s20] sm:$0xe]  ;;  %v4457_v36 = vld [vmem:[%s3995_s20 + $0x1c] sm:$0xf] }
  0xaf   : > { %3236 = vmatprep.mubr.msk.bf16.mxu1 %vm440_vm4, %v2871_v61  ;;  %3249 = vmatpush3.bf16.msra.mxu1 %v864_v28  ;;  %v790_v41 = vrot.slane %v4166_v34, 5  ;;  %v759_v11 = vrot.slane %v4007_v5, 5  ;;  %v2890_v19 = vrot.slane %v735_v56, 9  ;;  %v794_v51 = vrot.slane %v4189_v0, 5  ;;  %v3052_v37 = vld [vmem:[%s3995_s20 + $0x24] sm:$0xf] }
  0xb0   : > { %3507 = vmatprep.subr.msk.bf16.mxu1 %vm465_vm0, %v4365_v12  ;;  %v4414_v53 = vsel %vm4181_vm7, %v782_v50, %v783_v30  ;;  %v4421_v1 = vsel %vm4181_vm7, %v2889_v58, %v787_v52  ;;  %v789_v63 = vrot.slane %v787_v52, 4  ;;  %v797_v48 = vrot.slane %v4197_v16, 5  ;;  %v4467_v30 = vld [vmem:[%s3995_s20 + $0x28] sm:$0xf] }
  0xb1   : > { %v4439_v9 = vsel %vm4181_vm7, %v2890_v19, %v794_v51  ;;  %v796_v60 = vrot.slane %v794_v51, 4  ;;  %v762_v28 = vrot.slane %v4010_v6, 5  ;;  %v2874_v33 = vcombine.low %v4177_v46, %v4189_v0  ;;  %v3619_v6 = vld [vmem:[%s3995_s20 + $0x30] sm:$0xff]   ;;  %v4461_v0 = vld [vmem:[#allocation5 + $0x10] sm:$0x3] }
  0xb2   : > { %v4430_v34 = vsel %vm4181_vm7, %v789_v63, %v790_v41  ;;  %v2875_v16 = vcombine.low %v4211_v38, %v4221_v42  ;;  %v2885_v22 = vrot.slane %v730_v8, 9  ;;  %v761_v2 = vrot.slane %v759_v11, 4  ;;  %v737_v19 = vld [vmem:[%s3995_s20 + $0x54] sm:$0xe] }
  0xb3   : > { %v4450_v39 = vsel %vm4181_vm7, %v796_v60, %v797_v48  ;;  %v2286_v35 = vsel %vm465_vm0, %v4258_v20, 0  ;;  %v2044_v38 = vshrl.u32 %v3049_v17, 16  ;;  %v2891_v58 = vrot.slane %v736_v40, 9  ;;  %v3621_v48 = vld [vmem:[%s3995_s20 + $0x3c] sm:$0xff]  }
  0xb4   : > { %v801_v20 = vrot.slane %v4221_v42, 5  ;;  %v763_v50 = vsel %vm4181_vm7, %v761_v2, %v762_v28  ;;  %v2057_v42 = vshrl.u32 %v4457_v36, 16  ;;  %v2068_v52 = vshrl.u32 %v3052_v37, 16  ;;  %v3055_v2 = vld [vmem:[%s3995_s20 + $0x30] sm:$0xf] }
  0xb5   : > { %3317 = vmatmul.mubr.msk.bf16.gmra.mrb[12].mxu0 %vm440_vm4, %v3006_v44  ;;  %v760_v44 = vsel %vm4181_vm7, %v2885_v22, %v759_v11  ;;  %v2071_v63 = vshll.u32 %v3052_v37, 16  ;;  %v2077_v11 = vshll.u32 %v4467_v30, 16  ;;  %v2876_v51 = vcombine.low %v4250_v25, %v4256_v32 }
  0xb6   : > { %3237 = vmatmul.mubr.msk.bf16.gmra.mrb[4].mxu1 %vm440_vm4, %v2872_v13  ;;  %3322 = vmatprep.mubr.msk.bf16.mxu0 %vm440_vm4, %v3615_v7  ;;  %v2047_v13 = vshll.u32 %v3049_v17, 16  ;;  %v804_v7 = vrot.slane %v4229_v47, 5  ;;  %v4483_v41 = vsel %vm4181_vm7, %v2891_v58, %v801_v20  ;;  %v803_v56 = vrot.slane %v801_v20, 4  ;;  %v4497_v17 = vld [vmem:[%s3995_s20 + $0x20] sm:$0x1] }
  0xb7   : > { %3240 = vmatprep.mubr.msk.bf16.mxu1 %vm440_vm4, %v2873_v62  ;;  %v2053_v62 = vshll.u32 %v4457_v36, 16  ;;  %v2081_v47 = vshrl.u32 %v4467_v30, 16  ;;  %v2046_v8 = vrot.slane %v2044_v38, 4  ;;  %v2059_v40 = vrot.slane %v2057_v42, 4  ;;  %v4509_v38 = vld [vmem:[%s3995_s20 + $0x2c] sm:$0x1] }
  0xb8   : > { %v2049_v60 = vrot.slane %v2047_v13, 5  ;;  %v4493_v28 = vsel %vm4181_vm7, %v803_v56, %v804_v7  ;;  %v2070_v25 = vrot.slane %v2068_v52, 4  ;;  %v808_v37 = vrot.slane %v4256_v32, 5 }
  0xb9   : > { %v2073_v13 = vrot.slane %v2071_v63, 5  ;;  %v4511_v58 = vrot.slane %v2077_v11, 5  ;;  %v2083_v20 = vrot.slane %v2081_v47, 4  ;;  %v2095_v42 = vshll.u32 %v3055_v2, 16 }
  0xba   : > { %v810_v7 = vrot.slane %v808_v37, 4  ;;  %v2087_v11 = vshll.u32 %v4509_v38, 16 }
  0xbc   : > { %v2089_v46 = vrot.slane %v2087_v11, 5  ;;  %v4911_v11 = vcombine.low %v4387_v31, %v4399_v45 }
  0xbd   : > { %3323 = vmatmul.mubr.msk.bf16.vlgmr.msra.gmra.mrb[0].mxu0 %vm440_vm4, %v3617_v15  ;;  %v3622_v15 = vld [vmem:[%s3995_s20 + $0x48] sm:$0xff]  }
  0xbe   : > { %3241 = vmatmul.mubr.msk.bf16.gmra.mrb[8].mxu1 %vm440_vm4, %v2874_v33  ;;  %3339 = vmatpush3.bf16.msra.mxu0 %v2286_v35  ;;  %v2893_v33 = vcombine.low %v760_v44, %v763_v50  ;;  %v4505_v35 = vld [vmem:[%s3995_s20 + $0x34] sm:$0xf]  ;;  %v811_v44 = vrot.slane %v4267_v43, 5  ;;  %v2050_v50 = vor.u32 %v2049_v60, %v2046_v8  ;;  %v2092_v43 = vshrl.u32 %v3055_v2, 16  ;;  %v3058_v60 = vld [vmem:[%s3995_s20 + $0x3c] sm:$0xf] }
  0xbf   : > { %3244 = vmatprep.mubr.msk.bf16.mxu1 %vm440_vm4, %v2875_v16  ;;  %3326 = vmatprep.mubr.msk.bf16.mxu0 %vm440_vm4, %v3619_v6  ;;  %v4499_v16 = vrot.slane %v2053_v62, 5  ;;  %v2892_v6 = vrot.slane %v737_v19, 9  ;;  %v2063_v62 = vshll.u32 %v4497_v17, 16  ;;  %v2101_v52 = vshll.u32 %v4505_v35, 16  ;;  %v3623_v19 = vld [vmem:[%s3995_s20 + $0x54] sm:$0xff]  }
  0xc0   : > { %3513 = vmatprep.subr.msk.bf16.mxu0 %vm465_vm0, %v4461_v0  ;;  %v2105_v56 = vshrl.u32 %v4505_v35, 16  ;;  %v4529_v47 = vsel %vm4181_vm7, %v810_v7, %v811_v44  ;;  %v2051_v2 = vrot.slane %v2050_v50, 4  ;;  %v2094_v44 = vrot.slane %v2092_v43, 4  ;;  %v4549_v8 = vld [vmem:[%s3995_s20 + $0x38] sm:$0x1] }
  0xc1   : > { %v4519_v32 = vsel %vm4181_vm7, %v2892_v6, %v808_v37  ;;  %v2060_v63 = vor.u32 %v2059_v40, %v4499_v16  ;;  %v2065_v40 = vrot.slane %v2063_v62, 5  ;;  %v1066_v6 = vsel %vm465_vm0, %v4365_v12, 0  ;;  %v3061_v37 = vld [vmem:[%s3995_s20 + $0x48] sm:$0xf] }
  0xc2   : > { %v2097_v7 = vrot.slane %v2095_v42, 5  ;;  %v4543_v22 = vrot.slane %v2101_v52, 5  ;;  %v2116_v5 = vshrl.u32 %v3058_v60, 16  ;;  %v2119_v61 = vshll.u32 %v3058_v60, 16 }
  0xc3   : > { %v2140_v43 = vshrl.u32 %v3061_v37, 16  ;;  %v2143_v42 = vshll.u32 %v3061_v37, 16  ;;  %v4580_v37 = vld [vmem:[%s3995_s20 + $0x44] sm:$0x1] }
  0xc4   : > { %v2098_v55 = vor.u32 %v2097_v7, %v2094_v44  ;;  %v2118_v31 = vrot.slane %v2116_v5, 4  ;;  %v2121_v45 = vrot.slane %v2119_v61, 5 }
  0xc5   : > { %3327 = vmatmul.mubr.msk.bf16.gmra.mrb[4].mxu0 %vm440_vm4, %v3621_v48  ;;  %v2084_v48 = vor.u32 %v2083_v20, %v4511_v58  ;;  %v2061_v20 = vrot.slane %v2060_v63, 4  ;;  %v2142_v61 = vrot.slane %v2140_v43, 4  ;;  %v2145_v5 = vrot.slane %v2143_v42, 5 }
  0xc6   : > { %3245 = vmatmul.mubr.msk.bf16.gmra.mrb[12].mxu1 %vm440_vm4, %v2876_v51  ;;  %3330 = vmatprep.mubr.msk.bf16.mxu0 %vm440_vm4, %v3622_v15  ;;  %v2074_v51 = vor.u32 %v2073_v13, %v2070_v25  ;;  %v3624_v15 = vld [vmem:[%s3995_s20 + $0x60] sm:$0xff]   ;;  %v2107_v25 = vrot.slane %v2105_v56, 4  ;;  %v4546_v13 = vld [vmem:[%s3995_s20 + $0x4c] sm:$0xf]  ;;  %v2099_v7 = vrot.slane %v2098_v55, 4  ;;  %v2135_v63 = vshll.u32 %v4580_v37, 16 }
  0xc7   : > { %3250 = vmatprep.mubr.msk.bf16.mxu1 %vm440_vm4, %v2893_v33  ;;  %v4537_v33 = vld [vmem:[%s3995_s20 + $0x40] sm:$0xf]  ;;  %v2085_v50 = vrot.slane %v2084_v48, 4  ;;  %v2149_v52 = vshll.u32 %v4546_v13, 16  ;;  %v2153_v56 = vshrl.u32 %v4546_v13, 16  ;;  %v2066_v48 = vsel %vm4037_vm3, %v2061_v20, %v2065_v40 }
  0xc8   : > { %v2075_v18 = vrot.slane %v2074_v51, 4  ;;  %v2125_v62 = vshll.u32 %v4537_v33, 16  ;;  %v2129_v12 = vshrl.u32 %v4537_v33, 16  ;;  %v2108_v21 = vor.u32 %v2107_v25, %v4543_v22  ;;  %v3634_v40 = vld [vmem:[#allocation5 + $0x8] sm:$0x3] }
  0xc9   : > { %v2056_v51 = vsel %vm4037_vm3, %v2051_v2, %v4499_v16  ;;  %v4585_v2 = vld [vmem:[%s3995_s20 + $0x50] sm:$0x1]  ;;  %v4912_v55 = vcombine.low %v4403_v49, %v4414_v53  ;;  %v2104_v49 = vsel %vm4037_vm3, %v2099_v7, %v4543_v22  ;;  %v4623_v22 = vld [vmem:[%s3995_s20 + $0x5c] sm:$0x1] }
  0xca   : > { %v2080_v60 = vsel %vm4037_vm3, %v2075_v18, %v4511_v58  ;;  %v4582_v44 = vrot.slane %v2125_v62, 5  ;;  %v2131_v16 = vrot.slane %v2129_v12, 4  ;;  %v2155_v18 = vrot.slane %v2153_v56, 4  ;;  %v3064_v58 = vld [vmem:[%s3995_s20 + $0x54] sm:$0xf] }
  0xcb   : > { %v2109_v25 = vrot.slane %v2108_v21, 4  ;;  %v1339_v62 = vshrl.u32 %v4307_v59, 16  ;;  %v2159_v42 = vshll.u32 %v4585_v2, 16  ;;  %v2167_v56 = vshll.u32 %v3064_v58, 16 }
  0xcc   : > { %v2132_v43 = vor.u32 %v2131_v16, %v4582_v44  ;;  %v2146_v21 = vor.u32 %v2145_v5, %v2142_v61  ;;  %v2197_v16 = vshll.u32 %v4600_v14, 16 }
  0xcd   : > { %3331 = vmatmul.mubr.msk.bf16.gmra.mrb[8].mxu0 %vm440_vm4, %v3623_v19  ;;  %v3625_v19 = vld [vmem:[%s3995_s20 + $0x6c] sm:$0xff]   ;;  %v2161_v61 = vrot.slane %v2159_v42, 5  ;;  %v2540_v42 = vsel %vm465_vm0, %v4461_v0, 0  ;;  %v4915_v0 = vcombine.low %v4439_v9, %v4450_v39 }
  0xce   : > { %3251 = vmatmul.mubr.msk.bf16.vlgmr.msra.gmra.mrb[0].mxu1 %vm440_vm4, %v2894_v57  ;;  %3334 = vmatprep.mubr.msk.bf16.mxu0 %vm440_vm4, %v3624_v15  ;;  %v2111_v57 = vshll.u32 %v4549_v8, 16  ;;  %v2090_v15 = vsel %vm4037_vm3, %v2085_v50, %v2089_v46  ;;  %v3073_v46 = vcombine.low %v2056_v51, %v2066_v48  ;;  %v4592_v50 = vld [vmem:[%s3995_s20 + $0x58] sm:$0xf] }
  0xcf   : > { %3254 = vmatprep.mubr.msk.bf16.mxu1 %vm440_vm4, %v4911_v11  ;;  %3267 = vmatpush3.bf16.msra.mxu1 %v1066_v6  ;;  %v4588_v6 = vrot.slane %v2149_v52, 5  ;;  %v3074_v12 = vcombine.low %v2080_v60, %v2090_v15  ;;  %v2122_v11 = vor.u32 %v2121_v45, %v2118_v31  ;;  %v2164_v52 = vshrl.u32 %v3064_v58, 16 }
  0xd0   : > { %3509 = vmatprep.subr.msk.bf16.mxu1 %vm465_vm0, %v3634_v40  ;;  %v2113_v20 = vrot.slane %v2111_v57, 5  ;;  %v3067_v40 = vld [vmem:[%s3995_s20 + $0x60] sm:$0xf]  ;;  %v2173_v51 = vshll.u32 %v4592_v50, 16  ;;  %v2177_v48 = vshrl.u32 %v4592_v50, 16  ;;  %v4913_v31 = vcombine.low %v4421_v1, %v4430_v34 }
  0xd1   : > { %v2156_v57 = vor.u32 %v2155_v18, %v4588_v6  ;;  %v2191_v45 = vshll.u32 %v3067_v40, 16  ;;  %v2123_v60 = vrot.slane %v2122_v11, 4  ;;  %v2137_v15 = vrot.slane %v2135_v63, 5 }
  0xd2   : > { %v2114_v53 = vsel %vm4037_vm3, %v2109_v25, %v2113_v20  ;;  %v2201_v1 = vshrl.u32 %v4600_v14, 16  ;;  %v2133_v34 = vrot.slane %v2132_v43, 4  ;;  %v2166_v5 = vrot.slane %v2164_v52, 4  ;;  %v3070_v43 = vld [vmem:[%s3995_s20 + $0x6c] sm:$0xf] }
  0xd3   : > { %v2169_v18 = vrot.slane %v2167_v56, 5  ;;  %v2147_v58 = vrot.slane %v2146_v21, 4  ;;  %v4625_v7 = vrot.slane %v2173_v51, 5  ;;  %v2179_v25 = vrot.slane %v2177_v48, 4 }
  0xd4   : > { %v4914_v63 = vshll.u32 %v4307_v59, 16  ;;  %v1341_v11 = vrot.slane %v1339_v62, 4  ;;  %v3075_v52 = vcombine.low %v2104_v49, %v2114_v53  ;;  %v4634_v56 = vrot.slane %v2197_v16, 5 }
  0xd5   : > { %3335 = vmatmul.mubr.msk.bf16.gmra.mrb[12].mxu0 %vm440_vm4, %v3625_v19  ;;  %v2188_v19 = vshrl.u32 %v3067_v40, 16  ;;  %v2203_v21 = vrot.slane %v2201_v1, 4  ;;  %v2128_v51 = vsel %vm4037_vm3, %v2123_v60, %v4582_v44  ;;  %v2138_v59 = vsel %vm4037_vm3, %v2133_v34, %v2137_v15  ;;  %v3626_v34 = vld [vmem:[%s3995_s20 + $0xc] sm:$0xff]  }
  0xd6   : > { %3255 = vmatmul.mubr.msk.bf16.gmra.mrb[4].mxu1 %vm440_vm4, %v4912_v55  ;;  %3340 = vmatprep.mubr.msk.bf16.mxu0 %vm440_vm4, %v3073_v46  ;;  %v2157_v46 = vrot.slane %v2156_v57, 4  ;;  %v4629_v20 = vrot.slane %v4914_v63, 5  ;;  %v2193_v55 = vrot.slane %v2191_v45, 5  ;;  %v4637_v57 = vld [vmem:[%s3995_s20 + $0x70] sm:$0xf]  ;;  %v2170_v62 = vor.u32 %v2169_v18, %v2166_v5 }
  0xd7   : > { %3258 = vmatprep.mubr.msk.bf16.mxu1 %vm440_vm4, %v4913_v31  ;;  %v2190_v40 = vrot.slane %v2188_v19, 4  ;;  %v2183_v48 = vshll.u32 %v4623_v22, 16  ;;  %v4646_v31 = vld [vmem:[%s3995_s20 + $0x68] sm:$0x1]  ;;  %v2152_v49 = vsel %vm4037_vm3, %v2147_v58, %v4588_v6  ;;  %v2180_v53 = vor.u32 %v2179_v25, %v4625_v7  ;;  %v4672_v25 = vld [vmem:[%s3995_s20 + $0x74] sm:$0x1] }
  0xd8   : > { %v2162_v44 = vsel %vm4037_vm3, %v2157_v46, %v2161_v61  ;;  %v2212_v19 = vshrl.u32 %v3070_v43, 16  ;;  %v4916_v45 = vcombine.low %v4483_v41, %v4493_v28  ;;  %v2215_v39 = vshll.u32 %v3070_v43, 16 }
  0xd9   : > { %v2194_v9 = vor.u32 %v2193_v55, %v2190_v40  ;;  %v2225_v6 = vshrl.u32 %v4637_v57, 16  ;;  %v1342_v60 = vor.u32 %v1341_v11, %v4629_v20  ;;  %v1345_v15 = vshll.u32 %v4317_v4, 16 }
  0xda   : > { %v2204_v16 = vor.u32 %v2203_v21, %v4634_v56  ;;  %v2207_v1 = vshll.u32 %v4646_v31, 16  ;;  %v3076_v41 = vcombine.low %v2128_v51, %v2138_v59  ;;  %v2185_v28 = vrot.slane %v2183_v48, 5 }
  0xdb   : > { %v3077_v61 = vcombine.low %v2152_v49, %v2162_v44  ;;  %v2171_v5 = vrot.slane %v2170_v62, 4  ;;  %v2181_v18 = vrot.slane %v2180_v53, 4  ;;  %v2214_v58 = vrot.slane %v2212_v19, 4 }
  0xdc   : > { %v2195_v46 = vrot.slane %v2194_v9, 4  ;;  %v2217_v63 = vrot.slane %v2215_v39, 5  ;;  %v2227_v4 = vrot.slane %v2225_v6, 4  ;;  %v1343_v40 = vrot.slane %v1342_v60, 4  ;;  %v3627_v39 = vld [vmem:[%s3995_s20 + $0x18] sm:$0xff]  }
  0xdd   : > { %3341 = vmatmul.mubr.msk.bf16.vlgmr.msra.gmra.mrb[0].mxu0 %vm440_vm4, %v3074_v12  ;;  %v2221_v12 = vshll.u32 %v4637_v57, 16  ;;  %v1347_v55 = vrot.slane %v1345_v15, 5  ;;  %v2205_v43 = vrot.slane %v2204_v16, 4  ;;  %v4917_v21 = vcombine.low %v4519_v32, %v4529_v47  ;;  %v3628_v15 = vld [vmem:[%s3995_s20 + $0x24] sm:$0xff]  }
  0xde   : > { %3259 = vmatmul.mubr.msk.bf16.gmra.mrb[8].mxu1 %vm440_vm4, %v4915_v0  ;;  %3357 = vmatpush3.bf16.msra.mxu0 %v2540_v42  ;;  %v2209_v42 = vrot.slane %v2207_v1, 5  ;;  %v2176_v51 = vsel %vm4037_vm3, %v2171_v5, %v4625_v7  ;;  %v2186_v59 = vsel %vm4037_vm3, %v2181_v18, %v2185_v28  ;;  %v2231_v62 = vshll.u32 %v4672_v25, 16  ;;  %v3089_v0 = vld [vmem:[%s3995_s20 + $0x18] sm:$0xe]  ;;  %v3090_v28 = vld [vmem:[%s3995_s20 + $0x24] sm:$0xe] }
  0xdf   : > { %3262 = vmatprep.mubr.msk.bf16.mxu1 %vm440_vm4, %v4916_v45  ;;  %3344 = vmatprep.mubr.msk.bf16.mxu0 %vm440_vm4, %v3075_v52  ;;  %v4674_v11 = vrot.slane %v2221_v12, 5  ;;  %v2958_v52 = vld [vmem:[%s3995_s20 + $0x48] sm:$0xf]  ;;  %v2200_v32 = vsel %vm4037_vm3, %v2195_v46, %v4634_v56  ;;  %v2218_v47 = vor.u32 %v2217_v63, %v2214_v58  ;;  %v2435_v44 = vrot.slane %v4457_v36, 5  ;;  %v2955_v45 = vld [vmem:[%s3995_s20 + $0x3c] sm:$0xf] }
  0xe0   : > { %v1326_v7 = vshrl.u32 %v2958_v52, 16  ;;  %v2210_v49 = vsel %vm4037_vm3, %v2205_v43, %v2209_v42  ;;  %v1329_v53 = vshll.u32 %v2958_v52, 16  ;;  %v1348_v19 = vsel %vm4037_vm3, %v1343_v40, %v1347_v55  ;;  %v3091_v52 = vld [vmem:[%s3995_s20 + $0x30] sm:$0xe] }
  0xe1   : > { %v2228_v48 = vor.u32 %v2227_v4, %v4674_v11  ;;  %v3078_v56 = vcombine.low %v2176_v51, %v2186_v59  ;;  %v2233_v12 = vrot.slane %v2231_v62, 5  ;;  %v3097_v6 = vrot.slane %v3089_v0, 9 }
  0xe2   : > { %v1328_v9 = vrot.slane %v1326_v7, 4  ;;  %v1331_v60 = vrot.slane %v1329_v53, 5  ;;  %v3079_v16 = vcombine.low %v2200_v32, %v2210_v49  ;;  %v2219_v1 = vrot.slane %v2218_v47, 4  ;;  %v3629_v47 = vld [vmem:[%s3995_s20 + $0x30] sm:$0xff]  }
  0xe3   : > { %v2438_v36 = vrot.slane %v4497_v17, 5  ;;  %v1302_v5 = vshrl.u32 %v2955_v45, 16  ;;  %v1305_v58 = vshll.u32 %v2955_v45, 16  ;;  %v1311_v46 = vshll.u32 %v4289_v24, 16  ;;  %v3092_v45 = vld [vmem:[%s3995_s20 + $0x3c] sm:$0xe] }
  0xe4   : > { %v1332_v18 = vor.u32 %v1331_v60, %v1328_v9  ;;  %v1315_v63 = vshrl.u32 %v4289_v24, 16  ;;  %v2436_v4 = vsel %vm4181_vm7, %v3097_v6, %v2435_v44  ;;  %v3098_v40 = vrot.slane %v3090_v28, 9 }
  0xe5   : > { %3345 = vmatmul.mubr.msk.bf16.gmra.mrb[4].mxu0 %vm440_vm4, %v3076_v41  ;;  %v2229_v41 = vrot.slane %v2228_v48, 4  ;;  %v2224_v17 = vsel %vm4037_vm3, %v2219_v1, %v4674_v11  ;;  %v2445_v43 = vrot.slane %v4509_v38, 5  ;;  %v1304_v51 = vrot.slane %v1302_v5, 4 }
  0xe6   : > { %3263 = vmatmul.mubr.msk.bf16.gmra.mrb[12].mxu1 %vm440_vm4, %v4917_v21  ;;  %3348 = vmatprep.mubr.msk.bf16.mxu0 %vm440_vm4, %v3077_v61  ;;  %v2437_v61 = vrot.slane %v2435_v44, 4  ;;  %v2449_v21 = vrot.slane %v4505_v35, 5  ;;  %v1307_v59 = vrot.slane %v1305_v58, 5  ;;  %v4728_v62 = vrot.slane %v1311_v46, 5  ;;  %v2961_v44 = vld [vmem:[%s3995_s20 + $0x54] sm:$0xf] }
  0xe7   : > { %3268 = vmatprep.mubr.msk.bf16.mxu1 %vm440_vm4, %v3626_v34  ;;  %v2442_v34 = vrot.slane %v4467_v30, 5  ;;  %v1333_v30 = vrot.slane %v1332_v18, 4  ;;  %v2234_v24 = vsel %vm4037_vm3, %v2229_v41, %v2233_v12  ;;  %v1317_v32 = vrot.slane %v1315_v63, 4  ;;  %v3093_v12 = vld [vmem:[%s3995_s20 + $0x48] sm:$0xe] }
  0xe8   : > { %v2439_v42 = vsel %vm4181_vm7, %v2437_v61, %v2438_v36  ;;  %v3080_v48 = vcombine.low %v2224_v17, %v2234_v24  ;;  %v3099_v49 = vrot.slane %v3091_v52, 9  ;;  %v2452_v53 = vrot.slane %v4549_v8, 5  ;;  %v3631_v58 = vld [vmem:[%s3995_s20 + $0x48] sm:$0xff]   ;;  %v3094_v52 = vld [vmem:[%s3995_s20 + $0x54] sm:$0xe] }
  0xe9   : > { %v2444_v55 = vrot.slane %v2442_v34, 4  ;;  %v1338_v11 = vsel %vm4037_vm3, %v1333_v30, %v4629_v20  ;;  %v3105_v0 = vcombine.low %v2436_v4, %v2439_v42  ;;  %v2443_v35 = vsel %vm4181_vm7, %v3098_v40, %v2442_v34  ;;  %v3632_v30 = vld [vmem:[%s3995_s20 + $0x54] sm:$0xff]  }
  0xea   : > { %v4730_v38 = vcombine.low %v1338_v11, %v1348_v19  ;;  %v2451_v20 = vrot.slane %v2449_v21, 4  ;;  %v2456_v19 = vrot.slane %v4537_v33, 5  ;;  %v1321_v9 = vshll.u32 %v4292_v26, 16 }
  0xeb   : > { %v2446_v7 = vsel %vm4181_vm7, %v2444_v55, %v2445_v43  ;;  %v2463_v6 = vrot.slane %v4546_v13, 5  ;;  %v1350_v60 = vshrl.u32 %v2961_v44, 16  ;;  %v1363_v8 = vshrl.u32 %v4323_v10, 16  ;;  %v2964_v43 = vld [vmem:[%s3995_s20 + $0x60] sm:$0xf] }
  0xec   : > { %v3106_v26 = vcombine.low %v2443_v35, %v2446_v7  ;;  %v2450_v33 = vsel %vm4181_vm7, %v3099_v49, %v2449_v21  ;;  %v3100_v13 = vrot.slane %v3092_v45, 9  ;;  %v2459_v1 = vrot.slane %v4580_v37, 5 }
  0xed   : > { %3349 = vmatmul.mubr.msk.bf16.gmra.mrb[8].mxu0 %vm440_vm4, %v3078_v56  ;;  %v1318_v56 = vor.u32 %v1317_v32, %v4728_v62  ;;  %v2453_v41 = vsel %vm4181_vm7, %v2451_v20, %v2452_v53  ;;  %v2458_v28 = vrot.slane %v2456_v19, 4  ;;  %v1323_v34 = vrot.slane %v1321_v9, 5 }
  0xee   : > { %3269 = vmatmul.mubr.msk.bf16.vlgmr.msra.gmra.mrb[0].mxu1 %vm440_vm4, %v3627_v39  ;;  %3352 = vmatprep.mubr.msk.bf16.mxu0 %vm440_vm4, %v3079_v16  ;;  %v1308_v39 = vor.u32 %v1307_v59, %v1304_v51  ;;  %v1359_v16 = vshll.u32 %v4323_v10, 16  ;;  %v3101_v61 = vrot.slane %v3093_v12, 9  ;;  %v2465_v5 = vrot.slane %v2463_v6, 4 }
  0xef   : > { %3272 = vmatprep.mubr.msk.bf16.mxu1 %vm440_vm4, %v3628_v15  ;;  %3375 = vmatpush3.bf16.msra.mxu1 %v4003_v3  ;;  %v3630_v3 = vld [vmem:[%s3995_s20 + $0x3c] sm:$0xff]   ;;  %v1353_v15 = vshll.u32 %v2961_v44, 16  ;;  %v1319_v36 = vrot.slane %v1318_v56, 4  ;;  %v2466_v18 = vrot.slane %v4585_v2, 5  ;;  %v1352_v46 = vrot.slane %v1350_v60, 4 }
  0xf0   : > { %v1309_v10 = vrot.slane %v1308_v39, 4  ;;  %v1361_v4 = vrot.slane %v1359_v16, 5  ;;  %v1365_v40 = vrot.slane %v1363_v8, 4  ;;  %v3107_v37 = vcombine.low %v2450_v33, %v2453_v41 }
  0xf1   : > { %v1355_v63 = vrot.slane %v1353_v15, 5  ;;  %v2457_v17 = vsel %vm4181_vm7, %v3100_v13, %v2456_v19  ;;  %v2460_v24 = vsel %vm4181_vm7, %v2458_v28, %v2459_v1  ;;  %v2464_v55 = vsel %vm4181_vm7, %v3101_v61, %v2463_v6  ;;  %v3096_v28 = vld [vmem:[%s3995_s20 + $0x6c] sm:$0xe] }
  0xf2   : > { %v1314_v2 = vsel %vm4037_vm3, %v1309_v10, %v4728_v62  ;;  %v2467_v42 = vsel %vm4181_vm7, %v2465_v5, %v2466_v18  ;;  %v2470_v21 = vrot.slane %v4592_v50, 5  ;;  %v1369_v51 = vshll.u32 %v4326_v27, 16 }
  0xf3   : > { %v1324_v11 = vsel %vm4037_vm3, %v1319_v36, %v1323_v34  ;;  %v1356_v59 = vor.u32 %v1355_v63, %v1352_v46  ;;  %v1366_v32 = vor.u32 %v1365_v40, %v1361_v4  ;;  %v2477_v62 = vrot.slane %v4600_v14, 5  ;;  %v3633_v14 = vld [vmem:[%s3995_s20 + $0x60] sm:$0xff]  }
  0xf4   : > { %v1374_v50 = vshrl.u32 %v2964_v43, 16  ;;  %v1383_v27 = vshll.u32 %v4330_v23, 16  ;;  %v3109_v35 = vcombine.low %v2464_v55, %v2467_v42  ;;  %v3102_v7 = vrot.slane %v3094_v52, 9 }
  0xf5   : > { %3353 = vmatmul.mubr.msk.bf16.gmra.mrb[12].mxu0 %vm440_vm4, %v3080_v48  ;;  %v1377_v48 = vshll.u32 %v2964_v43, 16  ;;  %v2473_v49 = vrot.slane %v4623_v22, 5  ;;  %v2971_v44 = vcombine.low %v1314_v2, %v1324_v11  ;;  %v2472_v20 = vrot.slane %v2470_v21, 4 }
  0xf6   : > { %3273 = vmatmul.mubr.msk.bf16.gmra.mrb[4].mxu1 %vm440_vm4, %v3629_v47  ;;  %3358 = vmatprep.mubr.msk.bf16.mxu0 %vm440_vm4, %v3105_v0  ;;  %v3095_v47 = vld [vmem:[%s3995_s20 + $0x60] sm:$0xe]  ;;  %v3108_v0 = vcombine.low %v2457_v17, %v2460_v24  ;;  %v1371_v53 = vrot.slane %v1369_v51, 5  ;;  %v1357_v19 = vrot.slane %v1356_v59, 4  ;;  %v1367_v9 = vrot.slane %v1366_v32, 4 }
  0xf7   : > { %3276 = vmatprep.mubr.msk.bf16.mxu1 %vm440_vm4, %v3630_v3  ;;  %v1387_v3 = vshrl.u32 %v4330_v23, 16  ;;  %v3103_v45 = vrot.slane %v3095_v47, 9  ;;  %v2479_v39 = vrot.slane %v2477_v62, 4  ;;  %v2480_v56 = vrot.slane %v4646_v31, 5 }
  0xf8   : > { %v1376_v12 = vrot.slane %v1374_v50, 4  ;;  %v1379_v6 = vrot.slane %v1377_v48, 5  ;;  %v1385_v60 = vrot.slane %v1383_v27, 5  ;;  %v2471_v15 = vsel %vm4181_vm7, %v3102_v7, %v2470_v21 }
  0xf9   : > { %v1389_v23 = vrot.slane %v1387_v3, 4  ;;  %v2474_v22 = vsel %vm4181_vm7, %v2472_v20, %v2473_v49  ;;  %v1362_v16 = vsel %vm4037_vm3, %v1357_v19, %v1361_v4  ;;  %v2478_v31 = vsel %vm4181_vm7, %v3103_v45, %v2477_v62 }
  0xfa   : > { %v2481_v8 = vsel %vm4181_vm7, %v2479_v39, %v2480_v56  ;;  %v1372_v13 = vsel %vm4037_vm3, %v1367_v9, %v1371_v53  ;;  %v1380_v1 = vor.u32 %v1379_v6, %v1376_v12  ;;  %v2484_v34 = vrot.slane %v4637_v57, 5 }
  0xfb   : > { %v1390_v41 = vor.u32 %v1389_v23, %v1385_v60  ;;  %v3110_v61 = vcombine.low %v2471_v15, %v2474_v22  ;;  %v2973_v10 = vcombine.low %v1362_v16, %v1372_v13  ;;  %v3111_v36 = vcombine.low %v2478_v31, %v2481_v8 }
  0xfc   : > { %v3104_v18 = vrot.slane %v3096_v28, 9  ;;  %v2486_v63 = vrot.slane %v2484_v34, 4  ;;  %v2487_v4 = vrot.slane %v4672_v25, 5 }
  0xfd   : > { %3359 = vmatmul.mubr.msk.bf16.vlgmr.msra.gmra.mrb[0].mxu0 %vm440_vm4, %v3106_v26  ;;  %v4918_v26 = vld [vmem:[#allocation11_spill] sm:$0xff]  ;;  %v1391_v46 = vrot.slane %v1390_v41, 4 }
  0xfe   : > { %3277 = vmatmul.mubr.msk.bf16.gmra.mrb[8].mxu1 %vm440_vm4, %v3631_v58  ;;  %3362 = vmatprep.mubr.msk.bf16.mxu0 %vm440_vm4, %v3107_v37  ;;  %v1393_v33 = vshll.u32 %v4918_v26, 16  ;;  %v1381_v58 = vrot.slane %v1380_v1, 4  ;;  %v2485_v40 = vsel %vm4181_vm7, %v3104_v18, %v2484_v34  ;;  %v2488_v25 = vsel %vm4181_vm7, %v2486_v63, %v2487_v4 }
  0xff   : > { %3280 = vmatprep.mubr.msk.bf16.mxu1 %vm440_vm4, %v3632_v30 }
 0x100   : > { %v1395_v5 = vrot.slane %v1393_v33, 5  ;;  %v1386_v57 = vsel %vm4037_vm3, %v1381_v58, %v1385_v60 }
 0x102   : > { %v1396_v30 = vsel %vm4037_vm3, %v1391_v46, %v1395_v5 }
 0x103   : > { %v2974_v37 = vcombine.low %v1386_v57, %v1396_v30 }
 0x105   : > { %3363 = vmatmul.mubr.msk.bf16.gmra.mrb[4].mxu0 %vm440_vm4, %v3108_v0 }
 0x106   : > { %3281 = vmatmul.mubr.msk.bf16.gmra.mrb[12].mxu1 %vm440_vm4, %v3633_v14  ;;  %3366 = vmatprep.mubr.msk.bf16.mxu0 %vm440_vm4, %v3109_v35 }
 0x107   : > { %3294 = vmatprep.mubr.msk.bf16.mxu1 %vm440_vm4, %v2971_v44 }
 0x10d   : > { %3367 = vmatmul.mubr.msk.bf16.gmra.mrb[8].mxu0 %vm440_vm4, %v3110_v61 }
 0x10e   : > { %3295 = vmatmul.mubr.msk.bf16.vlgmr.msra.gmra.mrb[8].mxu1 %vm440_vm4, %v4730_v38  ;;  %3370 = vmatprep.mubr.msk.bf16.mxu0 %vm440_vm4, %v3111_v36  ;;  %v3112_v38 = vcombine.low %v2485_v40, %v2488_v25 }
 0x10f   : > { %3298 = vmatprep.mubr.msk.bf16.mxu1 %vm440_vm4, %v2973_v10 }
 0x115   : > { %3371 = vmatmul.mubr.msk.bf16.gmra.mrb[12].mxu0 %vm440_vm4, %v3112_v38 }
 0x116   : > { %3299 = vmatmul.mubr.msk.bf16.gmra.mrb[12].mxu1 %vm440_vm4, %v2974_v37 }
 0x1c1   : > { %v3270_v17 = vpop.f32.mrb[0].mxu1 }
 0x1c2   : > { %v1102_v24 = vpop.f32.mrb[1].mxu1 }
 0x1c3   : > { %v3271_v55 = vpop.f32.mrb[2].mxu1 }
 0x1c4   : > { %v1105_v43 = vpop.f32.mrb[3].mxu1 }
 0x1c9   : > { %v3274_v2 = vpop.f32.mrb[4].mxu1 }
 0x1ca   : > { %v1118_v42 = vpop.f32.mrb[5].mxu1 }
 0x1cb   : > { %v3275_v52 = vpop.f32.mrb[6].mxu1 }
 0x1cc   : > { %v1121_v21 = vpop.f32.mrb[7].mxu1 }
 0x1d0   : > { %v3360_v51 = vpop.f32.mrb[0].mxu0 }
 0x1d1   : > { %v3376_v29 = vadd.f32 %v3360_v51, %v3270_v17  ;;  %v2576_v11 = vpop.f32.mrb[1].mxu0 }
 0x1d2   : > { %v3361_v59 = vpop.f32.mrb[2].mxu0  ;;  %v3377_v54 = vadd.f32 %v2576_v11, %v1102_v24 }
 0x1d3   : > { %v3378_v32 = vadd.f32 %v3361_v59, %v3271_v55  ;;  %v2579_v47 = vpop.f32.mrb[3].mxu0 }
 0x1d4   : > { %v3379_v62 = vadd.f32 %v2579_v47, %v1105_v43  ;;  %2656 = vxpose.xlu0.b32.start [1/16] (narrow) %v3377_v54, 8 }
 0x1d8   : > { %v3364_v50 = vpop.f32.mrb[4].mxu0  ;;  %2657 = vxpose.xlu0.b32.cont [2/16] (narrow) %v3379_v62, 8 }
 0x1d9   : > { %v3380_v48 = vadd.f32 %v3364_v50, %v3274_v2  ;;  %v2592_v27 = vpop.f32.mrb[5].mxu0 }
 0x1da   : > { %v3381_v3 = vadd.f32 %v2592_v27, %v1118_v42  ;;  %v3365_v0 = vpop.f32.mrb[6].mxu0 }
 0x1db   : > { %v3382_v35 = vadd.f32 %v3365_v0, %v3275_v52  ;;  %v2595_v7 = vpop.f32.mrb[7].mxu0 }
 0x1dc   : > { %v3383_v49 = vadd.f32 %v2595_v7, %v1121_v21  ;;  %2658 = vxpose.xlu0.b32.cont [3/16] (narrow) %v3376_v29, 8 }
 0x1e0   : > { %v3368_v20 = vpop.f32.mrb[8].mxu0  ;;  %2659 = vxpose.xlu0.b32.cont [4/16] (narrow) %v3378_v32, 8 }
 0x1e1   : > { %v3296_v44 = vpop.f32.mrb[8].mxu1  ;;  %v2608_v14 = vpop.f32.mrb[9].mxu0 }
 0x1e2   : > { %v3384_v53 = vadd.f32 %v3368_v20, %v3296_v44  ;;  %v1516_v45 = vpop.f32.mrb[9].mxu1  ;;  %v3369_v39 = vpop.f32.mrb[10].mxu0 }
 0x1e3   : > { %v3385_v19 = vadd.f32 %v2608_v14, %v1516_v45  ;;  %v3297_v9 = vpop.f32.mrb[10].mxu1  ;;  %v2611_v6 = vpop.f32.mrb[11].mxu0 }
 0x1e4   : > { %v3386_v56 = vadd.f32 %v3369_v39, %v3297_v9  ;;  %v1519_v12 = vpop.f32.mrb[11].mxu1  ;;  %2660 = vxpose.xlu0.b32.cont [5/16] (narrow) %v3381_v3, 8 }
 0x1e5   : > { %v3387_v60 = vadd.f32 %v2611_v6, %v1519_v12 }
 0x1e8   : > { %v3372_v15 = vpop.f32.mrb[12].mxu0  ;;  %2661 = vxpose.xlu0.b32.cont [6/16] (narrow) %v3383_v49, 8 }
 0x1e9   : > { %v3300_v23 = vpop.f32.mrb[12].mxu1  ;;  %v2624_v31 = vpop.f32.mrb[13].mxu0 }
 0x1ea   : > { %v3388_v22 = vadd.f32 %v3372_v15, %v3300_v23  ;;  %v1532_v16 = vpop.f32.mrb[13].mxu1  ;;  %v3373_v33 = vpop.f32.mrb[14].mxu0 }
 0x1eb   : > { %v3389_v8 = vadd.f32 %v2624_v31, %v1532_v16  ;;  %v3301_v26 = vpop.f32.mrb[14].mxu1  ;;  %v2627_v41 = vpop.f32.mrb[15].mxu0 }
 0x1ec   : > { %v3390_v13 = vadd.f32 %v3373_v33, %v3301_v26  ;;  %v1535_v1 = vpop.f32.mrb[15].mxu1  ;;  %2662 = vxpose.xlu0.b32.cont [7/16] (narrow) %v3380_v48, 8 }
 0x1ed   : > { %v3391_v28 = vadd.f32 %v2627_v41, %v1535_v1 }
 0x1f0   : > { %2663 = vxpose.xlu0.b32.cont [8/16] (narrow) %v3382_v35, 8 }
 0x1f4   : > { %2664 = vxpose.xlu0.b32.cont [9/16] (narrow) %v3385_v19, 8 }
 0x1f8   : > { %2665 = vxpose.xlu0.b32.cont [10/16] (narrow) %v3387_v60, 8 }
 0x1fc   : > { %2666 = vxpose.xlu0.b32.cont [11/16] (narrow) %v3384_v53, 8 }
 0x200   : > { %2667 = vxpose.xlu0.b32.cont [12/16] (narrow) %v3386_v56, 8 }
 0x204   : > { %2668 = vxpose.xlu0.b32.cont [13/16] (narrow) %v3389_v8, 8 }
 0x208   : > { %2669 = vxpose.xlu0.b32.cont [14/16] (narrow) %v3391_v28, 8 }
 0x20c   : > { %2670 = vxpose.xlu0.b32.cont [15/16] (narrow) %v3388_v22, 8 }
 0x210   : > { %2671 = vxpose.xlu0.b32.end [16/16] (narrow) %v3390_v13, 8 }
 0x24f   : > { %2696 = sbr.rel (%p3123_p0) target bundleno = 920 (0x398), region = 40 }
 0x254   : > { %v2672_v34 = vpop.trf.xlu0 }
 0x255   : > { %2692 = vst [vmem:[%s2691_s28] sm:$0xff] %v2672_v34 }
 0x25c   : > { %v2697_v61 = vld [vmem:[%s4825_s18] sm:$0xff]  ;;  %v2698_v10 = vld [vmem:[%s4825_s18 + $0x8] sm:$0xff] }
 0x25d   : > { %v2699_v36 = vadd.f32 %v2698_v10, %v2697_v61 }
 0x25f   : > { %2700 = vadd.xlane.f32.xlu0 %v2699_v36 }
 0x2ec   : > { %v2701_v5 = vpop.xlane.xlu0 %2700 }
 0x2ed   : > { %v2702_v18 = vmul.f32 0.00390625, %v2701_v5 }
 0x2ef   : > { %v2703_v58 = vsub.f32 %v2697_v61, %v2702_v18  ;;  %v2704_v46 = vsub.f32 %v2698_v10, %v2702_v18 }
 0x2f1   : > { %v2705_v63 = vmul.f32 %v2703_v58, %v2703_v58  ;;  %v2706_v4 = vmul.f32 %v2704_v46, %v2704_v46 }
 0x2f3   : > { %v2707_v40 = vadd.f32 %v2706_v4, %v2705_v63 }
 0x2f5   : > { %2708 = vadd.xlane.f32.xlu0 %v2707_v40 }
 0x382   : > { %v2709_v57 = vpop.xlane.xlu0 %2708 }
 0x383   : > { %v2710_v30 = vmul.f32 0.00390625, %v2709_v57 }
 0x385   : > { %v2711_v25 = vadd.f32 1e-05, %v2710_v30 }
 0x387   : > { %3635 = vrsqrt.f32 %v2711_v25 }
 0x391   : > { %v3636_v37 = vpop.eup %3635 }
 0x392   : > { %v2713_v38 = vmul.f32 %v3636_v37, %v2703_v58  ;;  %v2714_v17 = vmul.f32 %v3636_v37, %v2704_v46 }
 0x394   : > { %vm2715_vm8 = vcmp.ge.f32.partialorder %v2713_v38, 0.0  ;;  %vm2716_vm9 = vcmp.ge.f32.partialorder %v2714_v17, 0.0  ;;  %v2717_v24 = vmul.f32 0.2, %v2713_v38  ;;  %v2718_v55 = vmul.f32 0.2, %v2714_v17 }
 0x396   : > { %v2719_v43 = vsel %vm2715_vm8, %v2713_v38, %v2717_v24  ;;  %v2720_v2 = vsel %vm2716_vm9, %v2714_v17, %v2718_v55 }
 0x397   : > { %2721 = vst [vmem:[%s4825_s18] sm:$0xff] %v2719_v43  ;;  %2722 = vst [vmem:[%s4825_s18 + $0x8] sm:$0xff] %v2720_v2 }
 0x398 PF: > { %s3130_s12 = sshll.u32 %s3785_s13, 8  ;;  %s2738_s5 = sshll.u32 %s4825_s18, 4  ;;  %s2739_s5 = int_to_ptr.vmem [resolvable:$true] %s2738_s5 }
 0x399   : > { %s4837_s3 = scalar_lea.hbm %s4888_s2, %s3130_s12  ;;  %s2724_s25 = scalar_lea.sflag [#allocation4], %s3982_s4 }
 0x39a   : > { %s3695_s6 = scalar_lea.vmem %s2739_s5, 256  ;;  %s3805_s23 = smov [#allocation7]  }
 0x39b   : > { %p3696_p11 = scmp.ne.s32.totalorder %s2739_s5, %s3695_s6  ;;  %s3699_s20 = sshll.u32 %s3805_s23, 4  ;;  %s3700_s20 = int_to_ptr.vmem [resolvable:$false] %s3699_s20 }
 0x39c   : > { %s3701_s19 = scalar_lea.vmem %s3700_s20, 512  ;;  %p3702_p13 = scmp.lt.s32.totalorder %s2739_s5, %s3700_s20 }
 0x39d   : > { %p3697_p10 = pnand %p3696_p11, %p3924_p8  ;;  %p3703_p3 = scmp.lt.s32.totalorder %s3701_s19, %s3695_s6 }
 0x39f   : > { %p3698_p12 = pneg %p3697_p10  ;;  %p3704_p7 = por %p3703_p3, %p3702_p13 }
 0x3a1   : > { %p3705_p1 = pnand %p3704_p7, %p3698_p12 }
 0x3a3   : > { %3708 = shalt.err (!%p3705_p1)
}
 0x3a4   : > { %s3709_s13 = scalar_lea.hbm %s4837_s3, 256  ;;  %s3713_s7 = scalar_lea.hbm %s4888_s2, 512 }
 0x3a5   : > { %p3710_p2 = scmp.ne.s32.totalorder %s4837_s3, %s3709_s13  ;;  %p3714_p9 = scmp.lt.u32.totalorder %s4837_s3, %s4888_s2 }
 0x3a6   : > { %p3715_p6 = scmp.lt.u32.totalorder %s3713_s7, %s3709_s13  ;;  %p3717_p11 = scmp.lt.u32.totalorder %s3709_s13, %s4837_s3 }
 0x3a7   : > { %p3711_p4 = pnand %p3710_p2, %p3924_p8 }
 0x3a8   : > { %p3716_p0 = por %p3715_p6, %p3714_p9 }
 0x3a9   : > { %p3712_p5 = pneg %p3711_p4 }
 0x3aa   : > { %p3718_p10 = por %p3717_p11, %p3716_p0 }
 0x3ac   : > { %p3719_p12 = pnand %p3718_p10, %p3712_p5 }
 0x3ae   : > { %3722 = shalt.err (!%p3719_p12)
}
 0x3af   : > { %3523 = dma.vmem_to_hbm [thread:$0]  (%p3924_p8), %s2739_s5, 256, %s4837_s3, %s2724_s25  }
 0x3b0 PF: > { %p3540_p13 = scmp.ge.s32.totalorder %s3797_s16, 2  ;;  %s2750_s28 = sand.u32 1, %s3769_s9  }
 0x3b1   : > { %p4919_p3 = scmp.ne.s32.totalorder %s4897_s22, 0  ;;  %s2751_s12 = scalar_lea.sflag [#allocation4], %s2750_s28 }
 0x3b3   : > { %p3534_p7 = pnand %p3540_p13, %p4919_p3 }
 0x3b5   : > { %3764 = dma.done.wait (!%p3534_p7), %s2751_s12, 256  }
 0x3b6   : > { %3766 = vsyncadd (!%p3534_p7), %s2751_s12, 4294967040  ;;  %s19_s16 = sadd.s32 1, %s3797_s16   ;;  %s4920_s9 = smov %s3773_s10 }
 0x3b7   : > { %p16_p1 = scmp.ge.s32.totalorder %s19_s16, 6   ;;  %s4921_s10 = smov %s3777_s11 }
 0x3b8   : > { %s4922_s11 = smov %s3941_s8  ;;  %s4923_s12 = smov %s3789_s14 }
 0x3b9   : > { %s4924_s13 = smov %s3793_s15  ;;  %s4925_s14 = smov %s4928_s24 }
 0x3ba   : > { %s4926_s15 = smov %s4932_s27  ;;  %18 = sbr.rel (!%p16_p1) target bundleno = 8 (0x8), region = 93 }
 0x3c1   :  { %2756 = vsyncpa [#allocation3], 1 }
 0x3c2   :  { %2758 = vsyncpa [#allocation3 + $0x1], 1 }
 0x3c3   :  { %2759 = vsyncpa [#allocation6], 1 }
 0x3c4   :  { %2760 = vsyncpa [#allocation4], 1 }
 0x3c5   :  { %2762 = vsyncpa [#allocation4 + $0x1], 1 }

</bundles_post_ra>
